<compile_context>
chip_gen: v7x
topology: tpu7x:2x2x1
jax: 0.10.0
libtpu: 0.0.40
codegen_flags: <defaults>
</compile_context>

<pallas_src>
import functools

import jax
import jax.numpy as jnp
from jax.experimental import pallas as pl
from jax.experimental.pallas import tpu as pltpu

COL0 = 16  # 16-aligned sublane start of the interior inside the padded scratch


# ----------------------------------------------------------------------------
# Kernel: one grid step = one image x one Th-row strip.
#   [1x1 conv (scale-folded) -> +bias -> ReLU6]   (only if expand_ratio != 1)
#   3x3 depthwise conv (stride s, pad 1, scale-folded) -> +bias -> ReLU6
#   1x1 conv (scale-folded) -> +bias
#   (+ residual if stride==1 and inp==oup)
# ----------------------------------------------------------------------------
def inverted_residual_kernel(*refs, Th, W, Cin, Hd, Cout, stride, identity,
                             has_expand):
    if has_expand:
        (xc_ref, xt_ref, xb_ref, w1_ref, b1_ref,
         wdw_ref, b2_ref, w3_ref, b3_ref, out_ref, hp_ref) = refs
    else:
        (xc_ref, xt_ref, xb_ref,
         wdw_ref, b2_ref, w3_ref, b3_ref, out_ref, hp_ref) = refs

    t = pl.program_id(1)
    nt = pl.num_programs(1)
    Th_o = Th // stride
    Wo = W // stride

    # --- strip rows (incl. 1-row halo each side), expanded if needed --------
    xs = jnp.concatenate([xt_ref[...], xc_ref[...], xb_ref[...]], axis=1)
    if has_expand:
        h = jnp.dot(xs.reshape((Th + 2) * W, Cin), w1_ref[...],
                    preferred_element_type=jnp.float32)
        h = jnp.clip(h + b1_ref[...], 0.0, 6.0)
        h = h.reshape(1, Th + 2, W, Hd).astype(jnp.bfloat16)
    else:
        h = xs  # expand_ratio == 1: hidden_dim == Cin, already bf16

    # --- scratch init (every step -> megacore-safe, both axes "parallel") ----
    hp_ref[:, :, pl.ds(COL0, W), :] = h                    # 16-aligned big store
    zcol = jnp.zeros((1, Th + 2, 1, Hd), jnp.bfloat16)
    hp_ref[:, :, pl.ds(COL0 - 1, 1), :] = zcol             # left halo column
    hp_ref[:, :, pl.ds(COL0 + W, 1), :] = zcol             # right halo column
    zrow = jnp.zeros((1, 1, W, Hd), jnp.bfloat16)

    @pl.when(t == 0)                                       # image top border
    def _():
        hp_ref[:, pl.ds(0, 1), pl.ds(COL0, W), :] = zrow

    @pl.when(t == nt - 1)                                  # image bottom border
    def _():
        hp_ref[:, pl.ds(Th + 1, 1), pl.ds(COL0, W), :] = zrow

    # --- 3x3 depthwise: 9 unrolled taps (VPU); rows decimated at the load ----
    wdw = wdw_ref[...]  # (3, 3, Hd), BN scale already folded in
    acc = None
    for kh in range(3):
        rows = pl.ds(kh, Th_o, stride) if stride == 2 else pl.ds(kh, Th_o)
        for kw in range(3):
            tap = hp_ref[:, rows, pl.ds(COL0 - 1 + kw, W), :].astype(jnp.float32)
            contrib = tap * wdw[kh, kw, :]
            acc = contrib if acc is None else acc + contrib
    if stride == 2:
        # column decimation: lane-merge reshape + static lane slice
        acc = acc.reshape(1, Th_o, Wo, 2 * Hd)[:, :, :, :Hd]
    acc = jnp.clip(acc + b2_ref[...], 0.0, 6.0)

    # --- 1x1 projection (MXU, bf16 in / f32 acc) + bias ----------------------
    o = jnp.dot(acc.reshape(Th_o * Wo, Hd).astype(jnp.bfloat16), w3_ref[...],
                preferred_element_type=jnp.float32)
    o = (o + b3_ref[...]).reshape(1, Th_o, Wo, Cout)

    # --- residual (bf16-rounded x, re-read from the resident center block) ---
    if identity:
        o = o + xc_ref[...].astype(jnp.float32)

    out_ref[...] = o


# ----------------------------------------------------------------------------
# Wrapper helpers.
# ----------------------------------------------------------------------------
def _pick_row_tile(H, stride, target=32):
    divs = [d for d in range(1, H + 1) if H % d == 0]
    ok = [d for d in divs if d <= target and (stride == 1 or d % 2 == 0)]
    multi = [d for d in ok if H // d >= 2]   # keep >= 2 strips when possible
    if multi:
        return max(multi)
    if ok:
        return max(ok)
    return H


def _pick_vmem_limit():
    # ~3/4 of physical VMEM, capped: 48 MiB on v7x (64 MiB/TC), 96 MiB on v5e/v6e.
    try:
        cap = int(pltpu.get_tpu_info().vmem_capacity_bytes)
    except Exception:
        cap = 64 * 1024 * 1024
    return max(32 * 1024 * 1024, min((cap * 3) // 4, 96 * 1024 * 1024))


def fold_params(p):
    """Fold BN scales into the conv weights (inference-form BN)."""
    return dict(
        w1f=(p["w1"] * p["s1"]).astype(jnp.bfloat16),           # (Cin, Hd)
        b1=p["b1"],                                              # (1, Hd)
        wdwf=(p["wdw"] * p["s2"].reshape(1, 1, -1)),             # (3, 3, Hd) f32
        b2=p["b2"],                                              # (1, Hd)
        w3f=(p["w3"] * p["s3"]).astype(jnp.bfloat16),            # (Hd, Cout)
        b3=p["b3"],                                              # (1, Cout)
    )


# ----------------------------------------------------------------------------
# NHWC entry point (no relayouts) and the NCHW PyTorch-shaped wrapper.
# ----------------------------------------------------------------------------
def inverted_residual_nhwc(x_nhwc, params, *, inp, oup, stride, expand_ratio,
                           row_tile=None):
    assert stride in (1, 2)
    hidden = int(round(inp * expand_ratio))
    identity = (stride == 1) and (inp == oup)
    has_expand = expand_ratio != 1

    x = x_nhwc.astype(jnp.bfloat16)           # halve the input DMA
    N, H, W, Cin = x.shape
    assert Cin == inp
    if stride == 2:
        assert H % 2 == 0 and W % 2 == 0, "stride=2 path assumes even H, W"
    Ho, Wo = H // stride, W // stride

    Th = row_tile if row_tile is not None else _pick_row_tile(H, stride)
    assert H % Th == 0 and (stride == 1 or Th % 2 == 0)
    nt = H // Th
    Th_o = Th // stride
    Wpad = W + 32                              # interior at COL0=16, zeros at 15 / 16+W

    fp = fold_params(params)

    kernel = functools.partial(
        inverted_residual_kernel,
        Th=Th, W=W, Cin=Cin, Hd=hidden, Cout=oup,
        stride=stride, identity=identity, has_expand=has_expand)

    const = lambda shape: pl.BlockSpec(shape, lambda n, t, _s=shape: (0,) * len(_s))

    in_specs = [
        # center strip
        pl.BlockSpec((1, Th, W, Cin), lambda n, t: (n, t, 0, 0)),
        # top halo row (clamped at image top; overwritten with zeros when t==0)
        pl.BlockSpec((1, 1, W, Cin),
                     lambda n, t: (n, jnp.maximum(t * Th - 1, 0), 0, 0)),
        # bottom halo row (clamped at image bottom; zeroed when t==last)
        pl.BlockSpec((1, 1, W, Cin),
                     lambda n, t: (n, jnp.minimum(t * Th + Th, H - 1), 0, 0)),
    ]
    args = [x, x, x]
    if has_expand:
        in_specs += [const((Cin, hidden)), const((1, hidden))]
        args += [fp["w1f"], fp["b1"]]
    in_specs += [const((3, 3, hidden)), const((1, hidden)),
                 const((hidden, oup)), const((1, oup))]
    args += [fp["wdwf"], fp["b2"], fp["w3f"], fp["b3"]]

    out = pl.pallas_call(
        kernel,
        out_shape=jax.ShapeDtypeStruct((N, Ho, Wo, oup), jnp.float32),
        grid=(N, nt),
        in_specs=in_specs,
        out_specs=pl.BlockSpec((1, Th_o, Wo, oup), lambda n, t: (n, t, 0, 0)),
        scratch_shapes=[pltpu.VMEM((1, Th + 2, Wpad, hidden), jnp.bfloat16)],
        compiler_params=pltpu.CompilerParams(
            dimension_semantics=("parallel", "parallel"),
            vmem_limit_bytes=_pick_vmem_limit()),
    )(*args)
    return out


def inverted_residual(x_nchw, params, *, inp, oup, stride, expand_ratio):
    # NCHW shim to match the PyTorch module; prefer the NHWC entry point above.
    x = jnp.transpose(x_nchw, (0, 2, 3, 1))
    y = inverted_residual_nhwc(x, params, inp=inp, oup=oup, stride=stride,
                               expand_ratio=expand_ratio)
    return jnp.transpose(y, (0, 3, 1, 2))


# ----------------------------------------------------------------------------
# Deterministic synthetic parameters (shapes match the nn.Module __init__).
# ----------------------------------------------------------------------------
def _bn_fold(key, c, eps=1e-5):
    kg, kb, km, kv = jax.random.split(key, 4)
    gamma = 1.0 + 0.05 * jax.random.normal(kg, (c,), jnp.float32)
    beta = 0.05 * jax.random.normal(kb, (c,), jnp.float32)
    mean = 0.05 * jax.random.normal(km, (c,), jnp.float32)
    var = 1.0 + 0.05 * jax.random.uniform(kv, (c,), jnp.float32)
    scale = gamma / jnp.sqrt(var + eps)
    bias = beta - mean * scale
    return scale.reshape(1, c), bias.reshape(1, c)


def make_params(key, inp, oup, expand_ratio):
    hidden = int(round(inp * expand_ratio))
    k1, k2, k3, kb1, kb2, kb3 = jax.random.split(key, 6)
    # PyTorch conv weights are (out, in, kh, kw); stored transposed for NHWC matmul.
    w1 = 0.2 * jax.random.normal(k1, (inp, hidden), jnp.float32)    # 1x1 expand
    wdw = 0.2 * jax.random.normal(k2, (3, 3, hidden), jnp.float32)  # depthwise
    w3 = 0.2 * jax.random.normal(k3, (hidden, oup), jnp.float32)    # 1x1 project
    s1, b1 = _bn_fold(kb1, hidden)
    s2, b2 = _bn_fold(kb2, hidden)
    s3, b3 = _bn_fold(kb3, oup)
    return dict(w1=w1, s1=s1, b1=b1, wdw=wdw, s2=s2, b2=b2,
                w3=w3, s3=s3, b3=b3)


# ----------------------------------------------------------------------------
# Pure-JAX reference mirroring the kernel numerics (bf16 MXU inputs, bf16
# depthwise scratch, folded BN scales, same tap accumulation order).
# ----------------------------------------------------------------------------
def ref_forward(x_nchw, p, *, inp, oup, stride, expand_ratio):
    hidden = int(round(inp * expand_ratio))
    identity = (stride == 1) and (inp == oup)
    has_expand = expand_ratio != 1
    fp = fold_params(p)

    x = jnp.transpose(x_nchw, (0, 2, 3, 1)).astype(jnp.bfloat16)
    if has_expand:
        h = jnp.einsum("nhwc,cd->nhwd", x, fp["w1f"],
                       preferred_element_type=jnp.float32)
        h = jnp.clip(h + fp["b1"].reshape(1, 1, 1, -1), 0.0, 6.0)
        h = h.astype(jnp.bfloat16)
    else:
        h = x
    h = h.astype(jnp.float32)

    N, H, W, C = h.shape
    Ho, Wo = H // stride, W // stride
    hp = jnp.pad(h, ((0, 0), (1, 1), (1, 1), (0, 0)))
    acc = None
    for kh in range(3):
        for kw in range(3):
            tap = hp[:, kh::stride, kw::stride, :][:, :Ho, :Wo, :]
            contrib = tap * fp["wdwf"][kh, kw]
            acc = contrib if acc is None else acc + contrib
    acc = jnp.clip(acc + fp["b2"].reshape(1, 1, 1, -1), 0.0, 6.0)

    o = jnp.einsum("nhwd,do->nhwo", acc.astype(jnp.bfloat16), fp["w3f"],
                   preferred_element_type=jnp.float32)
    o = o + fp["b3"].reshape(1, 1, 1, -1)
    if identity:
        o = o + x.astype(jnp.float32)
    return jnp.transpose(o, (0, 3, 1, 2))


if __name__ == "__main__":
    key = jax.random.PRNGKey(0)
    kx1, kx2, kx3, kp1, kp2, kp3 = jax.random.split(key, 6)

    cases = [
        # (inp, oup, stride, expand_ratio, x_key, p_key, label)
        (4, 4, 1, 6, kx1, kp1, "expand+residual"),
        (8, 8, 1, 1, kx2, kp2, "no-expand"),
        (4, 8, 2, 6, kx3, kp3, "stride2"),
    ]
    for inp, oup, stride, er, kx, kp, label in cases:
        x = jax.random.normal(kx, (2, inp, 16, 16), jnp.float32)  # NCHW
        p = make_params(kp, inp, oup, er)
        y = jax.block_until_ready(
            inverted_residual(x, p, inp=inp, oup=oup, stride=stride,
                              expand_ratio=er))
        r = ref_forward(x, p, inp=inp, oup=oup, stride=stride, expand_ratio=er)
        Hs = 16 if stride == 1 else 8
        assert y.shape == (2, oup, Hs, Hs), (label, y.shape)
        err = float(jnp.max(jnp.abs(y - r)))
        assert jnp.allclose(y, r, atol=5e-2, rtol=5e-2), (label, err)

    print("KERNEL_OK")
</pallas_src>

<mosaic_0001>
module attributes {stable_mosaic.version = 11 : i64} {
  func.func @inverted_residual_kernel(%arg0: i32, %arg1: i32, %arg2: memref<1x8x16x4xbf16, #tpu.memory_space<vmem>>, %arg3: memref<1x1x16x4xbf16, #tpu.memory_space<vmem>>, %arg4: memref<1x1x16x4xbf16, #tpu.memory_space<vmem>>, %arg5: memref<4x24xbf16, #tpu.memory_space<vmem>>, %arg6: memref<1x24xf32, #tpu.memory_space<vmem>>, %arg7: memref<3x3x24xf32, #tpu.memory_space<vmem>>, %arg8: memref<1x24xf32, #tpu.memory_space<vmem>>, %arg9: memref<24x4xbf16, #tpu.memory_space<vmem>>, %arg10: memref<1x4xf32, #tpu.memory_space<vmem>>, %arg11: memref<1x8x16x4xf32, #tpu.memory_space<vmem>>, %arg12: memref<1x10x48x24xbf16, #tpu.memory_space<vmem>>) attributes {dimension_semantics = [#tpu.dimension_semantics<parallel>, #tpu.dimension_semantics<parallel>], iteration_bounds = array<i64: 2, 2>, scalar_prefetch = 0 : i64, scratch_operands = 1 : i64, tpu.core_type = #tpu.core_type<tc>, window_params = [{transform_indices = @transform_0, window_bounds = array<i64: 1, 8, 16, 4>}, {transform_indices = @transform_1, window_bounds = array<i64: 1, 1, 16, 4>}, {transform_indices = @transform_2, window_bounds = array<i64: 1, 1, 16, 4>}, {pipeline_mode = #tpu.pipeline_mode<synchronous>, transform_indices = @transform_3, window_bounds = array<i64: 4, 24>}, {pipeline_mode = #tpu.pipeline_mode<synchronous>, transform_indices = @transform_4, window_bounds = array<i64: 1, 24>}, {pipeline_mode = #tpu.pipeline_mode<synchronous>, transform_indices = @transform_5, window_bounds = array<i64: 3, 3, 24>}, {pipeline_mode = #tpu.pipeline_mode<synchronous>, transform_indices = @transform_6, window_bounds = array<i64: 1, 24>}, {pipeline_mode = #tpu.pipeline_mode<synchronous>, transform_indices = @transform_7, window_bounds = array<i64: 24, 4>}, {pipeline_mode = #tpu.pipeline_mode<synchronous>, transform_indices = @transform_8, window_bounds = array<i64: 1, 4>}, {transform_indices = @transform_9, window_bounds = array<i64: 1, 8, 16, 4>}]} {
    %c0 = arith.constant 0 : index
    %c0_0 = arith.constant 0 : index
    %c0_1 = arith.constant 0 : index
    %c0_2 = arith.constant 0 : index
    %0 = vector.load %arg3[%c0, %c0_0, %c0_1, %c0_2] : memref<1x1x16x4xbf16, #tpu.memory_space<vmem>>, vector<1x1x16x4xbf16>
    %c0_3 = arith.constant 0 : index
    %c0_4 = arith.constant 0 : index
    %c0_5 = arith.constant 0 : index
    %c0_6 = arith.constant 0 : index
    %1 = vector.load %arg2[%c0_3, %c0_4, %c0_5, %c0_6] : memref<1x8x16x4xbf16, #tpu.memory_space<vmem>>, vector<1x8x16x4xbf16>
    %c0_7 = arith.constant 0 : index
    %c0_8 = arith.constant 0 : index
    %c0_9 = arith.constant 0 : index
    %c0_10 = arith.constant 0 : index
    %2 = vector.load %arg4[%c0_7, %c0_8, %c0_9, %c0_10] : memref<1x1x16x4xbf16, #tpu.memory_space<vmem>>, vector<1x1x16x4xbf16>
    %3 = tpu.concatenate %0, %1, %2 in 1 : vector<1x1x16x4xbf16>, vector<1x8x16x4xbf16>, vector<1x1x16x4xbf16> -> vector<1x10x16x4xbf16>
    %4 = vector.shape_cast %3 : vector<1x10x16x4xbf16> to vector<160x4xbf16>
    %c0_11 = arith.constant 0 : index
    %c0_12 = arith.constant 0 : index
    %5 = vector.load %arg5[%c0_11, %c0_12] : memref<4x24xbf16, #tpu.memory_space<vmem>>, vector<4x24xbf16>
    %cst = arith.constant dense<0.000000e+00> : vector<160x24xf32>
    %6 = tpu.matmul %4, %5, %cst {dimension_numbers = #tpu.dot_dimension_numbers<[1], [0], [0], [1], [0, 0, 1, 1], [], []>} : vector<160x4xbf16>, vector<4x24xbf16>, vector<160x24xf32> -> vector<160x24xf32>
    %c0_13 = arith.constant 0 : index
    %c0_14 = arith.constant 0 : index
    %7 = vector.load %arg6[%c0_13, %c0_14] : memref<1x24xf32, #tpu.memory_space<vmem>>, vector<1x24xf32>
    %8 = vector.broadcast %7 : vector<1x24xf32> to vector<160x24xf32>
    %9 = arith.addf %6, %8 : vector<160x24xf32>
    %cst_15 = arith.constant 0.000000e+00 : f32
    %cst_16 = arith.constant 6.000000e+00 : f32
    %10 = vector.broadcast %cst_15 : f32 to vector<160x24xf32>
    %11 = arith.maximumf %10, %9 : vector<160x24xf32>
    %12 = vector.broadcast %cst_16 : f32 to vector<160x24xf32>
    %13 = arith.minimumf %12, %11 : vector<160x24xf32>
    %14 = vector.shape_cast %13 : vector<160x24xf32> to vector<1x10x16x24xf32>
    %15 = arith.truncf %14 : vector<1x10x16x24xf32> to vector<1x10x16x24xbf16>
    %c0_17 = arith.constant 0 : index
    %c0_18 = arith.constant 0 : index
    %c16 = arith.constant 16 : index
    %c0_19 = arith.constant 0 : index
    %16 = vector.load %arg12[%c0_17, %c0_18, %c16, %c0_19] : memref<1x10x48x24xbf16, #tpu.memory_space<vmem>>, vector<1x10x16x24xbf16>
    tpu.vector_store %arg12[%c0_17, %c0_18, %c16, %c0_19], %15 {strides = array<i32>} : memref<1x10x48x24xbf16, #tpu.memory_space<vmem>>, vector<1x10x16x24xbf16>,
    %cst_20 = arith.constant 0.000000e+00 : bf16
    %17 = vector.broadcast %cst_20 : bf16 to vector<1x10x1x24xbf16>
    %c0_21 = arith.constant 0 : index
    %c0_22 = arith.constant 0 : index
    %c15 = arith.constant 15 : index
    %c0_23 = arith.constant 0 : index
    %18 = vector.load %arg12[%c0_21, %c0_22, %c15, %c0_23] : memref<1x10x48x24xbf16, #tpu.memory_space<vmem>>, vector<1x10x1x24xbf16>
    tpu.vector_store %arg12[%c0_21, %c0_22, %c15, %c0_23], %17 {strides = array<i32>} : memref<1x10x48x24xbf16, #tpu.memory_space<vmem>>, vector<1x10x1x24xbf16>,
    %c0_24 = arith.constant 0 : index
    %c0_25 = arith.constant 0 : index
    %c32 = arith.constant 32 : index
    %c0_26 = arith.constant 0 : index
    %19 = vector.load %arg12[%c0_24, %c0_25, %c32, %c0_26] : memref<1x10x48x24xbf16, #tpu.memory_space<vmem>>, vector<1x10x1x24xbf16>
    tpu.vector_store %arg12[%c0_24, %c0_25, %c32, %c0_26], %17 {strides = array<i32>} : memref<1x10x48x24xbf16, #tpu.memory_space<vmem>>, vector<1x10x1x24xbf16>,
    %cst_27 = arith.constant 0.000000e+00 : bf16
    %20 = vector.broadcast %cst_27 : bf16 to vector<1x1x16x24xbf16>
    %c0_i32 = arith.constant 0 : i32
    %21 = arith.cmpi eq, %arg1, %c0_i32 : i32
    %22 = arith.extui %21 : i1 to i32
    %c0_i32_28 = arith.constant 0 : i32
    %23 = arith.cmpi ne, %22, %c0_i32_28 : i32
    scf.if %23 {
      %c0_83 = arith.constant 0 : index
      %c0_84 = arith.constant 0 : index
      %c16_85 = arith.constant 16 : index
      %c0_86 = arith.constant 0 : index
      %119 = vector.load %arg12[%c0_83, %c0_84, %c16_85, %c0_86] : memref<1x10x48x24xbf16, #tpu.memory_space<vmem>>, vector<1x1x16x24xbf16>
      tpu.vector_store %arg12[%c0_83, %c0_84, %c16_85, %c0_86], %20 {strides = array<i32>} : memref<1x10x48x24xbf16, #tpu.memory_space<vmem>>, vector<1x1x16x24xbf16>,
    } else {
    }
    %c1_i32 = arith.constant 1 : i32
    %24 = arith.cmpi eq, %arg1, %c1_i32 : i32
    %25 = arith.extui %24 : i1 to i32
    %c0_i32_29 = arith.constant 0 : i32
    %26 = arith.cmpi ne, %25, %c0_i32_29 : i32
    scf.if %26 {
      %c0_83 = arith.constant 0 : index
      %c9 = arith.constant 9 : index
      %c16_84 = arith.constant 16 : index
      %c0_85 = arith.constant 0 : index
      %119 = vector.load %arg12[%c0_83, %c9, %c16_84, %c0_85] : memref<1x10x48x24xbf16, #tpu.memory_space<vmem>>, vector<1x1x16x24xbf16>
      tpu.vector_store %arg12[%c0_83, %c9, %c16_84, %c0_85], %20 {strides = array<i32>} : memref<1x10x48x24xbf16, #tpu.memory_space<vmem>>, vector<1x1x16x24xbf16>,
    } else {
    }
    %c0_30 = arith.constant 0 : index
    %c0_31 = arith.constant 0 : index
    %c0_32 = arith.constant 0 : index
    %27 = vector.load %arg7[%c0_30, %c0_31, %c0_32] : memref<3x3x24xf32, #tpu.memory_space<vmem>>, vector<3x3x24xf32>
    %c0_33 = arith.constant 0 : index
    %c0_34 = arith.constant 0 : index
    %c15_35 = arith.constant 15 : index
    %c0_36 = arith.constant 0 : index
    %28 = vector.load %arg12[%c0_33, %c0_34, %c15_35, %c0_36] : memref<1x10x48x24xbf16, #tpu.memory_space<vmem>>, vector<1x8x16x24xbf16>
    %29 = arith.extf %28 : vector<1x8x16x24xbf16> to vector<1x8x16x24xf32>
    %30 = vector.extract_strided_slice %27 {offsets = [0, 0, 0], sizes = [1, 1, 24], strides = [1, 1, 1]} : vector<3x3x24xf32> to vector<1x1x24xf32>
    %31 = vector.shape_cast %30 : vector<1x1x24xf32> to vector<24xf32>
    %32 = vector.shape_cast %31 : vector<24xf32> to vector<1x1x1x24xf32>
    %33 = vector.broadcast %32 : vector<1x1x1x24xf32> to vector<1x8x16x24xf32>
    %34 = arith.mulf %29, %33 : vector<1x8x16x24xf32>
    %c0_37 = arith.constant 0 : index
    %c0_38 = arith.constant 0 : index
    %c16_39 = arith.constant 16 : index
    %c0_40 = arith.constant 0 : index
    %35 = vector.load %arg12[%c0_37, %c0_38, %c16_39, %c0_40] : memref<1x10x48x24xbf16, #tpu.memory_space<vmem>>, vector<1x8x16x24xbf16>
    %36 = arith.extf %35 : vector<1x8x16x24xbf16> to vector<1x8x16x24xf32>
    %37 = vector.extract_strided_slice %27 {offsets = [0, 1, 0], sizes = [1, 1, 24], strides = [1, 1, 1]} : vector<3x3x24xf32> to vector<1x1x24xf32>
    %38 = vector.shape_cast %37 : vector<1x1x24xf32> to vector<24xf32>
    %39 = vector.shape_cast %38 : vector<24xf32> to vector<1x1x1x24xf32>
    %40 = vector.broadcast %39 : vector<1x1x1x24xf32> to vector<1x8x16x24xf32>
    %41 = arith.mulf %36, %40 : vector<1x8x16x24xf32>
    %42 = arith.addf %34, %41 : vector<1x8x16x24xf32>
    %c0_41 = arith.constant 0 : index
    %c0_42 = arith.constant 0 : index
    %c17 = arith.constant 17 : index
    %c0_43 = arith.constant 0 : index
    %43 = vector.load %arg12[%c0_41, %c0_42, %c17, %c0_43] : memref<1x10x48x24xbf16, #tpu.memory_space<vmem>>, vector<1x8x16x24xbf16>
    %44 = arith.extf %43 : vector<1x8x16x24xbf16> to vector<1x8x16x24xf32>
    %45 = vector.extract_strided_slice %27 {offsets = [0, 2, 0], sizes = [1, 1, 24], strides = [1, 1, 1]} : vector<3x3x24xf32> to vector<1x1x24xf32>
    %46 = vector.shape_cast %45 : vector<1x1x24xf32> to vector<24xf32>
    %47 = vector.shape_cast %46 : vector<24xf32> to vector<1x1x1x24xf32>
    %48 = vector.broadcast %47 : vector<1x1x1x24xf32> to vector<1x8x16x24xf32>
    %49 = arith.mulf %44, %48 : vector<1x8x16x24xf32>
    %50 = arith.addf %42, %49 : vector<1x8x16x24xf32>
    %c0_44 = arith.constant 0 : index
    %c1 = arith.constant 1 : index
    %c15_45 = arith.constant 15 : index
    %c0_46 = arith.constant 0 : index
    %51 = vector.load %arg12[%c0_44, %c1, %c15_45, %c0_46] : memref<1x10x48x24xbf16, #tpu.memory_space<vmem>>, vector<1x8x16x24xbf16>
    %52 = arith.extf %51 : vector<1x8x16x24xbf16> to vector<1x8x16x24xf32>
    %53 = vector.extract_strided_slice %27 {offsets = [1, 0, 0], sizes = [1, 1, 24], strides = [1, 1, 1]} : vector<3x3x24xf32> to vector<1x1x24xf32>
    %54 = vector.shape_cast %53 : vector<1x1x24xf32> to vector<24xf32>
    %55 = vector.shape_cast %54 : vector<24xf32> to vector<1x1x1x24xf32>
    %56 = vector.broadcast %55 : vector<1x1x1x24xf32> to vector<1x8x16x24xf32>
    %57 = arith.mulf %52, %56 : vector<1x8x16x24xf32>
    %58 = arith.addf %50, %57 : vector<1x8x16x24xf32>
    %c0_47 = arith.constant 0 : index
    %c1_48 = arith.constant 1 : index
    %c16_49 = arith.constant 16 : index
    %c0_50 = arith.constant 0 : index
    %59 = vector.load %arg12[%c0_47, %c1_48, %c16_49, %c0_50] : memref<1x10x48x24xbf16, #tpu.memory_space<vmem>>, vector<1x8x16x24xbf16>
    %60 = arith.extf %59 : vector<1x8x16x24xbf16> to vector<1x8x16x24xf32>
    %61 = vector.extract_strided_slice %27 {offsets = [1, 1, 0], sizes = [1, 1, 24], strides = [1, 1, 1]} : vector<3x3x24xf32> to vector<1x1x24xf32>
    %62 = vector.shape_cast %61 : vector<1x1x24xf32> to vector<24xf32>
    %63 = vector.shape_cast %62 : vector<24xf32> to vector<1x1x1x24xf32>
    %64 = vector.broadcast %63 : vector<1x1x1x24xf32> to vector<1x8x16x24xf32>
    %65 = arith.mulf %60, %64 : vector<1x8x16x24xf32>
    %66 = arith.addf %58, %65 : vector<1x8x16x24xf32>
    %c0_51 = arith.constant 0 : index
    %c1_52 = arith.constant 1 : index
    %c17_53 = arith.constant 17 : index
    %c0_54 = arith.constant 0 : index
    %67 = vector.load %arg12[%c0_51, %c1_52, %c17_53, %c0_54] : memref<1x10x48x24xbf16, #tpu.memory_space<vmem>>, vector<1x8x16x24xbf16>
    %68 = arith.extf %67 : vector<1x8x16x24xbf16> to vector<1x8x16x24xf32>
    %69 = vector.extract_strided_slice %27 {offsets = [1, 2, 0], sizes = [1, 1, 24], strides = [1, 1, 1]} : vector<3x3x24xf32> to vector<1x1x24xf32>
    %70 = vector.shape_cast %69 : vector<1x1x24xf32> to vector<24xf32>
    %71 = vector.shape_cast %70 : vector<24xf32> to vector<1x1x1x24xf32>
    %72 = vector.broadcast %71 : vector<1x1x1x24xf32> to vector<1x8x16x24xf32>
    %73 = arith.mulf %68, %72 : vector<1x8x16x24xf32>
    %74 = arith.addf %66, %73 : vector<1x8x16x24xf32>
    %c0_55 = arith.constant 0 : index
    %c2 = arith.constant 2 : index
    %c15_56 = arith.constant 15 : index
    %c0_57 = arith.constant 0 : index
    %75 = vector.load %arg12[%c0_55, %c2, %c15_56, %c0_57] : memref<1x10x48x24xbf16, #tpu.memory_space<vmem>>, vector<1x8x16x24xbf16>
    %76 = arith.extf %75 : vector<1x8x16x24xbf16> to vector<1x8x16x24xf32>
    %77 = vector.extract_strided_slice %27 {offsets = [2, 0, 0], sizes = [1, 1, 24], strides = [1, 1, 1]} : vector<3x3x24xf32> to vector<1x1x24xf32>
    %78 = vector.shape_cast %77 : vector<1x1x24xf32> to vector<24xf32>
    %79 = vector.shape_cast %78 : vector<24xf32> to vector<1x1x1x24xf32>
    %80 = vector.broadcast %79 : vector<1x1x1x24xf32> to vector<1x8x16x24xf32>
    %81 = arith.mulf %76, %80 : vector<1x8x16x24xf32>
    %82 = arith.addf %74, %81 : vector<1x8x16x24xf32>
    %c0_58 = arith.constant 0 : index
    %c2_59 = arith.constant 2 : index
    %c16_60 = arith.constant 16 : index
    %c0_61 = arith.constant 0 : index
    %83 = vector.load %arg12[%c0_58, %c2_59, %c16_60, %c0_61] : memref<1x10x48x24xbf16, #tpu.memory_space<vmem>>, vector<1x8x16x24xbf16>
    %84 = arith.extf %83 : vector<1x8x16x24xbf16> to vector<1x8x16x24xf32>
    %85 = vector.extract_strided_slice %27 {offsets = [2, 1, 0], sizes = [1, 1, 24], strides = [1, 1, 1]} : vector<3x3x24xf32> to vector<1x1x24xf32>
    %86 = vector.shape_cast %85 : vector<1x1x24xf32> to vector<24xf32>
    %87 = vector.shape_cast %86 : vector<24xf32> to vector<1x1x1x24xf32>
    %88 = vector.broadcast %87 : vector<1x1x1x24xf32> to vector<1x8x16x24xf32>
    %89 = arith.mulf %84, %88 : vector<1x8x16x24xf32>
    %90 = arith.addf %82, %89 : vector<1x8x16x24xf32>
    %c0_62 = arith.constant 0 : index
    %c2_63 = arith.constant 2 : index
    %c17_64 = arith.constant 17 : index
    %c0_65 = arith.constant 0 : index
    %91 = vector.load %arg12[%c0_62, %c2_63, %c17_64, %c0_65] : memref<1x10x48x24xbf16, #tpu.memory_space<vmem>>, vector<1x8x16x24xbf16>
    %92 = arith.extf %91 : vector<1x8x16x24xbf16> to vector<1x8x16x24xf32>
    %93 = vector.extract_strided_slice %27 {offsets = [2, 2, 0], sizes = [1, 1, 24], strides = [1, 1, 1]} : vector<3x3x24xf32> to vector<1x1x24xf32>
    %94 = vector.shape_cast %93 : vector<1x1x24xf32> to vector<24xf32>
    %95 = vector.shape_cast %94 : vector<24xf32> to vector<1x1x1x24xf32>
    %96 = vector.broadcast %95 : vector<1x1x1x24xf32> to vector<1x8x16x24xf32>
    %97 = arith.mulf %92, %96 : vector<1x8x16x24xf32>
    %98 = arith.addf %90, %97 : vector<1x8x16x24xf32>
    %c0_66 = arith.constant 0 : index
    %c0_67 = arith.constant 0 : index
    %99 = vector.load %arg8[%c0_66, %c0_67] : memref<1x24xf32, #tpu.memory_space<vmem>>, vector<1x24xf32>
    %100 = vector.shape_cast %99 : vector<1x24xf32> to vector<1x1x1x24xf32>
    %101 = vector.broadcast %100 : vector<1x1x1x24xf32> to vector<1x8x16x24xf32>
    %102 = arith.addf %98, %101 : vector<1x8x16x24xf32>
    %cst_68 = arith.constant 0.000000e+00 : f32
    %cst_69 = arith.constant 6.000000e+00 : f32
    %103 = vector.broadcast %cst_68 : f32 to vector<1x8x16x24xf32>
    %104 = arith.maximumf %103, %102 : vector<1x8x16x24xf32>
    %105 = vector.broadcast %cst_69 : f32 to vector<1x8x16x24xf32>
    %106 = arith.minimumf %105, %104 : vector<1x8x16x24xf32>
    %107 = vector.shape_cast %106 : vector<1x8x16x24xf32> to vector<128x24xf32>
    %108 = arith.truncf %107 : vector<128x24xf32> to vector<128x24xbf16>
    %c0_70 = arith.constant 0 : index
    %c0_71 = arith.constant 0 : index
    %109 = vector.load %arg9[%c0_70, %c0_71] : memref<24x4xbf16, #tpu.memory_space<vmem>>, vector<24x4xbf16>
    %cst_72 = arith.constant dense<0.000000e+00> : vector<128x4xf32>
    %110 = tpu.matmul %108, %109, %cst_72 {dimension_numbers = #tpu.dot_dimension_numbers<[1], [0], [0], [1], [0, 0, 1, 1], [], []>} : vector<128x24xbf16>, vector<24x4xbf16>, vector<128x4xf32> -> vector<128x4xf32>
    %c0_73 = arith.constant 0 : index
    %c0_74 = arith.constant 0 : index
    %111 = vector.load %arg10[%c0_73, %c0_74] : memref<1x4xf32, #tpu.memory_space<vmem>>, vector<1x4xf32>
    %112 = vector.broadcast %111 : vector<1x4xf32> to vector<128x4xf32>
    %113 = arith.addf %110, %112 : vector<128x4xf32>
    %114 = vector.shape_cast %113 : vector<128x4xf32> to vector<1x8x16x4xf32>
    %c0_75 = arith.constant 0 : index
    %c0_76 = arith.constant 0 : index
    %c0_77 = arith.constant 0 : index
    %c0_78 = arith.constant 0 : index
    %115 = vector.load %arg2[%c0_75, %c0_76, %c0_77, %c0_78] : memref<1x8x16x4xbf16, #tpu.memory_space<vmem>>, vector<1x8x16x4xbf16>
    %116 = arith.extf %115 : vector<1x8x16x4xbf16> to vector<1x8x16x4xf32>
    %117 = arith.addf %114, %116 : vector<1x8x16x4xf32>
    %c0_79 = arith.constant 0 : index
    %c0_80 = arith.constant 0 : index
    %c0_81 = arith.constant 0 : index
    %c0_82 = arith.constant 0 : index
    %118 = vector.load %arg11[%c0_79, %c0_80, %c0_81, %c0_82] : memref<1x8x16x4xf32, #tpu.memory_space<vmem>>, vector<1x8x16x4xf32>
    tpu.vector_store %arg11[%c0_79, %c0_80, %c0_81, %c0_82], %117 {strides = array<i32>} : memref<1x8x16x4xf32, #tpu.memory_space<vmem>>, vector<1x8x16x4xf32>,
    return
  }
  func.func @transform_0(%arg0: i32, %arg1: i32) -> (i32, i32, i32, i32) {
    %c0_i32 = arith.constant 0 : i32
    %c0_i32_0 = arith.constant 0 : i32
    %c0_i32_1 = arith.constant 0 : i32
    return %arg0, %arg1, %c0_i32, %c0_i32_0 : i32, i32, i32, i32
  }
  func.func @transform_1(%arg0: i32, %arg1: i32) -> (i32, i32, i32, i32) {
    %c8_i32 = arith.constant 8 : i32
    %0 = arith.muli %arg1, %c8_i32 : i32
    %c1_i32 = arith.constant 1 : i32
    %1 = arith.subi %0, %c1_i32 : i32
    %c0_i32 = arith.constant 0 : i32
    %2 = arith.maxsi %1, %c0_i32 : i32
    %c0_i32_0 = arith.constant 0 : i32
    %c0_i32_1 = arith.constant 0 : i32
    %c0_i32_2 = arith.constant 0 : i32
    return %arg0, %2, %c0_i32_0, %c0_i32_1 : i32, i32, i32, i32
  }
  func.func @transform_2(%arg0: i32, %arg1: i32) -> (i32, i32, i32, i32) {
    %c8_i32 = arith.constant 8 : i32
    %0 = arith.muli %arg1, %c8_i32 : i32
    %c8_i32_0 = arith.constant 8 : i32
    %1 = arith.addi %0, %c8_i32_0 : i32
    %c15_i32 = arith.constant 15 : i32
    %2 = arith.minsi %1, %c15_i32 : i32
    %c0_i32 = arith.constant 0 : i32
    %c0_i32_1 = arith.constant 0 : i32
    %c0_i32_2 = arith.constant 0 : i32
    return %arg0, %2, %c0_i32, %c0_i32_1 : i32, i32, i32, i32
  }
  func.func @transform_3(%arg0: i32, %arg1: i32) -> (i32, i32) {
    %c0_i32 = arith.constant 0 : i32
    %c0_i32_0 = arith.constant 0 : i32
    %c0_i32_1 = arith.constant 0 : i32
    return %c0_i32, %c0_i32_0 : i32, i32
  }
  func.func @transform_4(%arg0: i32, %arg1: i32) -> (i32, i32) {
    %c0_i32 = arith.constant 0 : i32
    %c0_i32_0 = arith.constant 0 : i32
    %c0_i32_1 = arith.constant 0 : i32
    return %c0_i32, %c0_i32_0 : i32, i32
  }
  func.func @transform_5(%arg0: i32, %arg1: i32) -> (i32, i32, i32) {
    %c0_i32 = arith.constant 0 : i32
    %c0_i32_0 = arith.constant 0 : i32
    %c0_i32_1 = arith.constant 0 : i32
    %c0_i32_2 = arith.constant 0 : i32
    return %c0_i32, %c0_i32_0, %c0_i32_1 : i32, i32, i32
  }
  func.func @transform_6(%arg0: i32, %arg1: i32) -> (i32, i32) {
    %c0_i32 = arith.constant 0 : i32
    %c0_i32_0 = arith.constant 0 : i32
    %c0_i32_1 = arith.constant 0 : i32
    return %c0_i32, %c0_i32_0 : i32, i32
  }
  func.func @transform_7(%arg0: i32, %arg1: i32) -> (i32, i32) {
    %c0_i32 = arith.constant 0 : i32
    %c0_i32_0 = arith.constant 0 : i32
    %c0_i32_1 = arith.constant 0 : i32
    return %c0_i32, %c0_i32_0 : i32, i32
  }
  func.func @transform_8(%arg0: i32, %arg1: i32) -> (i32, i32) {
    %c0_i32 = arith.constant 0 : i32
    %c0_i32_0 = arith.constant 0 : i32
    %c0_i32_1 = arith.constant 0 : i32
    return %c0_i32, %c0_i32_0 : i32, i32
  }
  func.func @transform_9(%arg0: i32, %arg1: i32) -> (i32, i32, i32, i32) {
    %c0_i32 = arith.constant 0 : i32
    %c0_i32_0 = arith.constant 0 : i32
    %c0_i32_1 = arith.constant 0 : i32
    return %arg0, %arg1, %c0_i32, %c0_i32_0 : i32, i32, i32, i32
  }
}

</mosaic_0001>

<bundles_post_ra>
// kernel: tpu_custom_call.1
= control target key start
LH: loop header
LB: loop body
LE: loop exit
PB: predicated region body
PF: predicated region fallthrough
CT: control target
= control target key end

     0   :  { %s2977_s30 = smov 0   ;;  %s2979_s10 = smov 0   ;;  %s3812_s0 = inlined_call_operand.vmem [shape: bf16[2,16,16,4], index: 0, kind: input, shape index: {}]   ;;  %s3813_s1 = inlined_call_operand.vmem [shape: bf16[2,16,16,4], index: 1, kind: input, shape index: {}]   ;;  %s3814_s2 = inlined_call_operand.vmem [shape: bf16[2,16,16,4], index: 2, kind: input, shape index: {}]   ;;  %s3815_s3 = inlined_call_operand.vmem [shape: bf16[4,24], index: 3, kind: input, shape index: {}]   ;;  %s3816_s4 = inlined_call_operand.vmem [shape: f32[1,24], index: 4, kind: input, shape index: {}]   ;;  %s3817_s5 = inlined_call_operand.vmem [shape: f32[3,3,24], index: 5, kind: input, shape index: {}]   ;;  %s3818_s6 = inlined_call_operand.vmem [shape: f32[1,24], index: 6, kind: input, shape index: {}]   ;;  %s3819_s7 = inlined_call_operand.vmem [shape: bf16[24,4], index: 7, kind: input, shape index: {}]   ;;  %s3820_s8 = inlined_call_operand.vmem [shape: f32[1,4], index: 8, kind: input, shape index: {}]   ;;  %s3821_s9 = inlined_call_operand.vmem [shape: f32[2,16,16,4], index: 9, kind: output, shape index: {}]  }
   0x1   :  { %3822 = sst [smem:[#allocation3_spill]] %s3812_s0  ;;  %s2981_s11 = smov 0  }
   0x2   :  { %s2983_s12 = smov 0   ;;  %s2985_s13 = smov 0  }
   0x3 LB: > { %s28_s14 = sadd.s32 1, %s2915_s11  ;;  %s31_s15 = sadd.s32 1, %s2919_s12  ;;  %s2923_s13 = sphi %s2985_s13, %s19_s13   ;;  %s2919_s12 = sphi %s2983_s12, %s3831_s12   ;;  %s2915_s11 = sphi %s2981_s11, %s3830_s11   ;;  %s2911_s10 = sphi %s2979_s10, %s3829_s10   ;;  %s2907_s30 = sphi %s2977_s30, %s3828_s30  }
   0x4   : > { %p29_p0 = scmp.ge.s32.totalorder %s28_s14, 2  ;;  %p2661_p1 = scmp.ge.s32.totalorder %s2923_s13, 1 }
   0x5   : > { %p373_p2 = scmp.lt.s32.totalorder %s2923_s13, 5 }
   0x6   : > { %s3833_s14 = smov (%p29_p0, %s28_s14), 0  ;;  %s3835_s15 = smov (!%p29_p0, %s31_s15), %s2919_s12 }
   0x7   : > { %p374_p3 = pnand %p2661_p1, %p373_p2  ;;  %p33_p4 = scmp.ge.s32.totalorder %s3835_s15, 2 }
   0x8   : > { %v522_v0 = vld [vmem:[%s3815_s3] sm:$0x3] (!%p374_p3)  ;;  %vm611_vm0 = vcmask (!%p374_p3), 1041408   ;;  %s2662_s18 = sshll.u32 (!%p374_p3), %s2907_s30, 3  ;;  %p446_p5 = scmp.lt.s32.totalorder (!%p374_p3), %s2911_s10, 1  ;;  %vm580_vm1 = vcmask (!%p374_p3), 31744  }
   0x9   : > { %s3837_s15 = smov (%p33_p4, %s3835_s15), 0  ;;  %377 = sbr.rel (%p374_p3) target bundleno = 743 (0x2e7), region = 56 }
   0xa   : > { %2828 = vmatprep.subr.msk.bf16.mxu0 (!%p374_p3), %vm611_vm0, %v522_v0  ;;  %v613_v1 = vsel (!%p374_p3), %vm611_vm0, %v522_v0, 0  ;;  %p448_p6 = scmp.lt.s32.totalorder (!%p374_p3), %s2662_s18, 15  ;;  %s2667_s19 = sadd.s32 (!%p374_p3), 4294967295, %s2662_s18  ;;  %vm789_vm2 = vcmask (!%p374_p3), 195591   ;;  %vm790_vm3 = vsmask.f32 (!%p374_p3), 7966 }
   0xb   : > { %2787 = vmatpush3.bf16.msra.mxu0 (!%p374_p3), %v613_v1  ;;  %p458_p7 = scmp.gt.s32.totalorder (!%p374_p3), %s2667_s19, 0  ;;  %p2668_p8 = scmp.lt.s32.totalorder (!%p374_p3), %s2667_s19, 15  ;;  %vm822_vm4 = vcmask (!%p374_p3), 188416   ;;  %vm3047_vm5 = vmand (!%p374_p3), %vm789_vm2, %vm790_vm3  ;;  %v792_v13 = vld [vmem:[#allocation2] sm:$0x80] (!%p374_p3)  ;;  %vm778_vm8 = vcmask (!%p374_p3), 195584  }
   0xc   : > { %s474_s24 = sadd.s32 (!%p374_p3), 8, %s2662_s18  ;;  %s3823_s0 = sld [smem:[#allocation3_spill]] (!%p374_p3)  ;;  %v795_v14 = vld [vmem:[#allocation2 + $0x18] sm:$0x80] (!%p374_p3)  ;;  %vm823_vm6 = vsmask.f32 (!%p374_p3), 256 }
   0xd   : > { %p475_p9 = scmp.lt.s32.totalorder (!%p374_p3), %s474_s24, 15  ;;  %v793_v15 = vsel (!%p374_p3), %vm3047_vm5, 0, %v792_v13  ;;  %v796_v16 = vsel (!%p374_p3), %vm3047_vm5, 0, %v795_v14  ;;  %v798_v17 = vld [vmem:[#allocation2 + $0x30] sm:$0x80] (!%p374_p3)  ;;  %vm3065_vm7 = vmand (!%p374_p3), %vm822_vm4, %vm823_vm6  ;;  %p2708_p10 = scmp.ne.s32.totalorder (!%p374_p3), %s2907_s30, 0 }
   0xe   : > { %v801_v18 = vld [vmem:[#allocation2 + $0x48] sm:$0x80] (!%p374_p3)  ;;  %794 = vst [vmem:[#allocation2] sm:$0x80] (!%p374_p3), %v793_v15  ;;  %797 = vst [vmem:[#allocation2 + $0x18] sm:$0x80] (!%p374_p3), %v796_v16 }
   0xf   : > { %v799_v19 = vsel (!%p374_p3), %vm3047_vm5, 0, %v798_v17  ;;  %v802_v20 = vsel (!%p374_p3), %vm3047_vm5, 0, %v801_v18  ;;  %v804_v21 = vld [vmem:[#allocation2 + $0x60] sm:$0x80] (!%p374_p3)  ;;  %v807_v22 = vld [vmem:[#allocation2 + $0x78] sm:$0x80] (!%p374_p3) }
  0x10   : > { %s3839_s10 = smov (!%p446_p5, %s2911_s10), 1  ;;  %s3841_s19 = smov (!%p458_p7, %s2667_s19), 0  ;;  %800 = vst [vmem:[#allocation2 + $0x30] sm:$0x80] %v799_v19  ;;  %803 = vst [vmem:[#allocation2 + $0x48] sm:$0x80] %v802_v20 }
  0x11   : > { %s449_s20 = scalar_select %p448_p6, %s2662_s18, 15  ;;  %v805_v23 = vsel %vm3047_vm5, 0, %v804_v21  ;;  %v808_v24 = vsel %vm3047_vm5, 0, %v807_v22  ;;  %v810_v25 = vld [vmem:[#allocation2 + $0x90] sm:$0x80] }
  0x12   : > { %s2664_s21 = sshll.u32 %s3839_s10, 5  ;;  %s3843_s24 = smov (!%p475_p9, %s474_s24), 15  ;;  %v813_v26 = vld [vmem:[#allocation2 + $0xa8] sm:$0x80]  ;;  %806 = vst [vmem:[#allocation2 + $0x60] sm:$0x80] %v805_v23 }
  0x13   : > { %s2663_s22 = sshll.u32 %s449_s20, 1  ;;  %s3845_s19 = smov (!%p2668_p8, %s3841_s19), 15  ;;  %809 = vst [vmem:[#allocation2 + $0x78] sm:$0x80] %v808_v24  ;;  %v811_v28 = vsel %vm3047_vm5, 0, %v810_v25  ;;  %v814_v29 = vsel %vm3047_vm5, 0, %v813_v26 }
  0x14   : > { %s452_s23 = sadd.s32 %s2664_s21, %s2663_s22  ;;  %s3847_s24 = smov (!%p475_p9, %s3843_s24), 15  ;;  %v816_v30 = vld [vmem:[#allocation2 + $0xc0] sm:$0x80]  ;;  %v819_v31 = vld [vmem:[#allocation2 + $0xd8] sm:$0x80] }
  0x15   : > { %s2665_s25 = sshll.u32 %s452_s23, 2  ;;  %s2686_s29 = sshll.u32 %s452_s23, 3  ;;  %812 = vst [vmem:[#allocation2 + $0x90] sm:$0x80] %v811_v28  ;;  %815 = vst [vmem:[#allocation2 + $0xa8] sm:$0x80] %v814_v29 }
  0x16   : > { %s3016_s28 = scalar_lea.vmem %s3823_s0, %s2665_s25  ;;  %s2673_s10 = sshll.u32 %s3845_s19, 1  ;;  %v817_v32 = vsel %vm3047_vm5, 0, %v816_v30  ;;  %v820_v33 = vsel %vm3047_vm5, 0, %v819_v31  ;;  %v825_v34 = vld [vmem:[#allocation2 + $0x10] sm:$0x1] }
  0x17   : > { %s3021_s18 = scalar_lea.vmem %s3821_s9, %s2686_s29  ;;  %s466_s20 = sadd.s32 %s2673_s10, %s2664_s21  ;;  %v2873_v2 = vld [vmem:[%s3016_s28] sm:$0xff]   ;;  %v2874_v3 = vld [vmem:[%s3016_s28 + $0x8] sm:$0xff]   ;;  %v2875_v5 = vld [vmem:[%s3016_s28 + $0x10] sm:$0xff]   ;;  %818 = vst [vmem:[#allocation2 + $0xc0] sm:$0x80] %v817_v32  ;;  %v826_v36 = vsel %vm3065_vm7, 0, %v825_v34 }
  0x18   : > { %s2680_s22 = sshll.u32 %s3847_s24, 1  ;;  %s2675_s25 = sshll.u32 %s466_s20, 2  ;;  %v2876_v6 = vld [vmem:[%s3016_s28 + $0x18] sm:$0xff]   ;;  %v2877_v7 = vld [vmem:[%s3016_s28 + $0x20] sm:$0xff]   ;;  %v2878_v8 = vld [vmem:[%s3016_s28 + $0x28] sm:$0xff]  }
  0x19   : > { %s483_s26 = sadd.s32 %s2680_s22, %s2664_s21  ;;  %s468_s0 = scalar_lea.vmem %s3813_s1, %s2675_s25  ;;  %v2879_v9 = vld [vmem:[%s3016_s28 + $0x30] sm:$0xff]   ;;  %v2880_v10 = vld [vmem:[%s3016_s28 + $0x38] sm:$0xff]   ;;  %v828_v35 = vld [vmem:[#allocation2 + $0x28] sm:$0x1]  ;;  %821 = vst [vmem:[#allocation2 + $0xd8] sm:$0x80] %v820_v33 }
  0x1a   : > { %s2682_s19 = sshll.u32 %s483_s26, 2  ;;  %v2872_v4 = vld [vmem:[%s468_s0] sm:$0xff]   ;;  %v829_v37 = vsel %vm3065_vm7, 0, %v828_v35  ;;  %v834_v39 = vld [vmem:[#allocation2 + $0x58] sm:$0x1] }
  0x1b   : > { %s485_s17 = scalar_lea.vmem %s3814_s2, %s2682_s19  ;;  %2788 = vmatprep.mubr.msk.bf16.mxu0 %vm580_vm1, %v2872_v4  ;;  %v831_v38 = vld [vmem:[#allocation2 + $0x40] sm:$0x1]  ;;  %827 = vst [vmem:[#allocation2 + $0x10] sm:$0x1] %v826_v36  ;;  %830 = vst [vmem:[#allocation2 + $0x28] sm:$0x1] %v829_v37 }
  0x1c   : > { %2789 = vmatmul.mubr.msk.bf16.vlgmr.msra.gmra.mrb[0].mxu0 %vm580_vm1, %v2873_v2  ;;  %v2881_v11 = vld [vmem:[%s485_s17] sm:$0xff]   ;;  %v832_v40 = vsel %vm3065_vm7, 0, %v831_v38  ;;  %v835_v41 = vsel %vm3065_vm7, 0, %v834_v39  ;;  %v837_v42 = vld [vmem:[#allocation2 + $0x70] sm:$0x1] }
  0x1d   : > { %2792 = vmatprep.mubr.msk.bf16.mxu0 %vm580_vm1, %v2874_v3  ;;  %v840_v43 = vld [vmem:[#allocation2 + $0x88] sm:$0x1]  ;;  %833 = vst [vmem:[#allocation2 + $0x40] sm:$0x1] %v832_v40  ;;  %836 = vst [vmem:[#allocation2 + $0x58] sm:$0x1] %v835_v41 }
  0x1e   : > { %v838_v44 = vsel %vm3065_vm7, 0, %v837_v42  ;;  %v841_v45 = vsel %vm3065_vm7, 0, %v840_v43  ;;  %v843_v46 = vld [vmem:[#allocation2 + $0xa0] sm:$0x1]  ;;  %v846_v47 = vld [vmem:[#allocation2 + $0xb8] sm:$0x1] }
  0x1f   : > { %839 = vst [vmem:[#allocation2 + $0x70] sm:$0x1] %v838_v44  ;;  %842 = vst [vmem:[#allocation2 + $0x88] sm:$0x1] %v841_v45  ;;  %v844_v48 = vsel %vm3065_vm7, 0, %v843_v46  ;;  %v847_v49 = vsel %vm3065_vm7, 0, %v846_v47 }
  0x20   : > { %v849_v50 = vld [vmem:[#allocation2 + $0xd0] sm:$0x1]  ;;  %v852_v51 = vld [vmem:[#allocation2 + $0xe8] sm:$0x1]  ;;  %845 = vst [vmem:[#allocation2 + $0xa0] sm:$0x1] %v844_v48 }
  0x21   : > { %848 = vst [vmem:[#allocation2 + $0xb8] sm:$0x1] %v847_v49  ;;  %v850_v52 = vsel %vm3065_vm7, 0, %v849_v50  ;;  %v853_v53 = vsel %vm3065_vm7, 0, %v852_v51  ;;  %v3100_v54 = vld [vmem:[%s3816_s4] ss:$0 sm:$0xff] }
  0x22   : > { %851 = vst [vmem:[#allocation2 + $0xd0] sm:$0x1] %v850_v52  ;;  %854 = vst [vmem:[#allocation2 + $0xe8] sm:$0x1] %v853_v53 }
  0x24   : > { %2793 = vmatmul.mubr.msk.bf16.gmra.mrb[4].mxu0 %vm580_vm1, %v2875_v5 }
  0x25   : > { %2796 = vmatprep.mubr.msk.bf16.mxu0 %vm580_vm1, %v2876_v6 }
  0x2c   : > { %2797 = vmatmul.mubr.msk.bf16.gmra.mrb[8].mxu0 %vm580_vm1, %v2877_v7 }
  0x2d   : > { %2800 = vmatprep.mubr.msk.bf16.mxu0 %vm580_vm1, %v2878_v8 }
  0x34   : > { %2801 = vmatmul.mubr.msk.bf16.gmra.mrb[12].mxu0 %vm580_vm1, %v2879_v9 }
  0x35   : > { %2804 = vmatprep.mubr.msk.bf16.mxu0 %vm580_vm1, %v2880_v10 }
  0x3c   : > { %2805 = vmatmul.mubr.msk.bf16.gmra.mrb[16].mxu0 %vm580_vm1, %v2881_v11 }
  0xef   : > { %v2790_v55 = vpop.f32.mrb[0].mxu0 }
  0xf0   : > { %v658_v56 = vadd.f32 %v2790_v55, %v3100_v54  ;;  %v649_v57 = vpop.f32.mrb[1].mxu0 }
  0xf1   : > { %v650_v58 = vadd.f32 %v3100_v54, %v649_v57  ;;  %v2791_v59 = vpop.f32.mrb[2].mxu0 }
  0xf2   : > { %v730_v60 = vmax.f32 %v658_v56, 0.0  ;;  %v661_v61 = vadd.f32 %v2791_v59, %v3100_v54  ;;  %v652_v62 = vpop.f32.mrb[3].mxu0 }
  0xf3   : > { %v728_v63 = vmax.f32 %v650_v58, 0.0  ;;  %v653_v0 = vadd.f32 %v3100_v54, %v652_v62 }
  0xf4   : > { %v731_v1 = vmax.f32 %v661_v61, 0.0  ;;  %v750_v3 = vmin.f32 %v730_v60, 6.0 }
  0xf5   : > { %v729_v2 = vmax.f32 %v653_v0, 0.0  ;;  %v748_v5 = vmin.f32 %v728_v63, 6.0 }
  0xf6   : > { %v751_v4 = vmin.f32 %v731_v1, 6.0 }
  0xf7   : > { %v749_v6 = vmin.f32 %v729_v2, 6.0  ;;  %v2794_v7 = vpop.f32.mrb[4].mxu0 }
  0xf8   : > { %v769_v8 = vpack.c.bf16 %v751_v4, %v750_v3  ;;  %v674_v9 = vadd.f32 %v2794_v7, %v3100_v54  ;;  %v665_v10 = vpop.f32.mrb[5].mxu0 }
  0xf9   : > { %v768_v11 = vpack.c.bf16 %v749_v6, %v748_v5  ;;  %v666_v12 = vadd.f32 %v3100_v54, %v665_v10  ;;  %v2795_v13 = vpop.f32.mrb[6].mxu0 }
  0xfa   : > { %780 = vst.msk [vmem:[#allocation2 + $0x20] sm:$0xff] %vm778_vm8, %v769_v8  ;;  %v734_v14 = vmax.f32 %v674_v9, 0.0  ;;  %v677_v15 = vadd.f32 %v2795_v13, %v3100_v54  ;;  %v668_v16 = vpop.f32.mrb[7].mxu0 }
  0xfb   : > { %779 = vst.msk [vmem:[#allocation2 + $0x8] sm:$0xff] %vm778_vm8, %v768_v11  ;;  %v732_v17 = vmax.f32 %v666_v12, 0.0  ;;  %v669_v18 = vadd.f32 %v3100_v54, %v668_v16 }
  0xfc   : > { %v735_v19 = vmax.f32 %v677_v15, 0.0  ;;  %v754_v21 = vmin.f32 %v734_v14, 6.0 }
  0xfd   : > { %v733_v20 = vmax.f32 %v669_v18, 0.0  ;;  %v752_v23 = vmin.f32 %v732_v17, 6.0  ;;  %v2925_v18 = vmov (!%p2708_p10), 0  }
  0xfe   : > { %v755_v22 = vmin.f32 %v735_v19, 6.0  ;;  %859 = vst.msk [vmem:[#allocation2 + $0x8] sm:$0xff] (!%p2708_p10), %vm778_vm8, %v2925_v18 }
  0xff   : > { %v753_v24 = vmin.f32 %v733_v20, 6.0  ;;  %v2798_v25 = vpop.f32.mrb[8].mxu0 }
 0x100   : > { %v771_v26 = vpack.c.bf16 %v755_v22, %v754_v21  ;;  %v690_v27 = vadd.f32 %v2798_v25, %v3100_v54  ;;  %v681_v28 = vpop.f32.mrb[9].mxu0 }
 0x101   : > { %v770_v29 = vpack.c.bf16 %v753_v24, %v752_v23  ;;  %v682_v30 = vadd.f32 %v3100_v54, %v681_v28  ;;  %v2799_v31 = vpop.f32.mrb[10].mxu0 }
 0x102   : > { %782 = vst.msk [vmem:[#allocation2 + $0x50] sm:$0xff] %vm778_vm8, %v771_v26  ;;  %v738_v32 = vmax.f32 %v690_v27, 0.0  ;;  %v693_v33 = vadd.f32 %v2799_v31, %v3100_v54  ;;  %v684_v34 = vpop.f32.mrb[11].mxu0 }
 0x103   : > { %781 = vst.msk [vmem:[#allocation2 + $0x38] sm:$0xff] %vm778_vm8, %v770_v29  ;;  %v736_v35 = vmax.f32 %v682_v30, 0.0  ;;  %v685_v36 = vadd.f32 %v3100_v54, %v684_v34 }
 0x104   : > { %v739_v37 = vmax.f32 %v693_v33, 0.0  ;;  %v758_v39 = vmin.f32 %v738_v32, 6.0 }
 0x105   : > { %v737_v38 = vmax.f32 %v685_v36, 0.0  ;;  %v756_v41 = vmin.f32 %v736_v35, 6.0 }
 0x106   : > { %v759_v40 = vmin.f32 %v739_v37, 6.0 }
 0x107   : > { %v757_v42 = vmin.f32 %v737_v38, 6.0  ;;  %v2802_v43 = vpop.f32.mrb[12].mxu0 }
 0x108   : > { %v773_v44 = vpack.c.bf16 %v759_v40, %v758_v39  ;;  %v706_v45 = vadd.f32 %v2802_v43, %v3100_v54  ;;  %v697_v46 = vpop.f32.mrb[13].mxu0 }
 0x109   : > { %v772_v47 = vpack.c.bf16 %v757_v42, %v756_v41  ;;  %v698_v48 = vadd.f32 %v3100_v54, %v697_v46  ;;  %v2803_v49 = vpop.f32.mrb[14].mxu0 }
 0x10a   : > { %784 = vst.msk [vmem:[#allocation2 + $0x80] sm:$0xff] %vm778_vm8, %v773_v44  ;;  %v742_v50 = vmax.f32 %v706_v45, 0.0  ;;  %v709_v51 = vadd.f32 %v2803_v49, %v3100_v54  ;;  %v700_v52 = vpop.f32.mrb[15].mxu0 }
 0x10b   : > { %783 = vst.msk [vmem:[#allocation2 + $0x68] sm:$0xff] %vm778_vm8, %v772_v47  ;;  %v740_v53 = vmax.f32 %v698_v48, 0.0  ;;  %v701_v55 = vadd.f32 %v3100_v54, %v700_v52 }
 0x10c   : > { %v743_v56 = vmax.f32 %v709_v51, 0.0  ;;  %v762_v58 = vmin.f32 %v742_v50, 6.0 }
 0x10d   : > { %v741_v57 = vmax.f32 %v701_v55, 0.0  ;;  %v760_v60 = vmin.f32 %v740_v53, 6.0 }
 0x10e   : > { %v763_v59 = vmin.f32 %v743_v56, 6.0 }
 0x10f   : > { %v761_v61 = vmin.f32 %v741_v57, 6.0  ;;  %v2806_v62 = vpop.f32.mrb[16].mxu0 }
 0x110   : > { %v775_v63 = vpack.c.bf16 %v763_v59, %v762_v58  ;;  %v722_v0 = vadd.f32 %v2806_v62, %v3100_v54  ;;  %v713_v1 = vpop.f32.mrb[17].mxu0 }
 0x111   : > { %v774_v2 = vpack.c.bf16 %v761_v61, %v760_v60  ;;  %v714_v3 = vadd.f32 %v3100_v54, %v713_v1  ;;  %v2807_v4 = vpop.f32.mrb[18].mxu0 }
 0x112   : > { %786 = vst.msk [vmem:[#allocation2 + $0xb0] sm:$0xff] %vm778_vm8, %v775_v63  ;;  %v746_v5 = vmax.f32 %v722_v0, 0.0  ;;  %v725_v6 = vadd.f32 %v2807_v4, %v3100_v54  ;;  %v716_v7 = vpop.f32.mrb[19].mxu0 }
 0x113   : > { %785 = vst.msk [vmem:[#allocation2 + $0x98] sm:$0xff] %vm778_vm8, %v774_v2  ;;  %v744_v8 = vmax.f32 %v714_v3, 0.0  ;;  %v717_v9 = vadd.f32 %v3100_v54, %v716_v7 }
 0x114   : > { %v747_v10 = vmax.f32 %v725_v6, 0.0  ;;  %v766_v12 = vmin.f32 %v746_v5, 6.0 }
 0x115   : > { %v745_v11 = vmax.f32 %v717_v9, 0.0  ;;  %v764_v14 = vmin.f32 %v744_v8, 6.0  ;;  %858 = sbr.rel (%p2708_p10) target bundleno = 284 (0x11c), region = 60 }
 0x116   : > { %v767_v13 = vmin.f32 %v747_v10, 6.0 }
 0x117   : > { %v765_v15 = vmin.f32 %v745_v11, 6.0 }
 0x118   : > { %v777_v16 = vpack.c.bf16 %v767_v13, %v766_v12 }
 0x119   : > { %v776_v17 = vpack.c.bf16 %v765_v15, %v764_v14 }
 0x11a   : > { %788 = vst.msk [vmem:[#allocation2 + $0xe0] sm:$0xff] %vm778_vm8, %v777_v16 }
 0x11b   : > { %787 = vst.msk [vmem:[#allocation2 + $0xc8] sm:$0xff] %vm778_vm8, %v776_v17 }
 0x11c PF: > { %p2709_p11 = scmp.ne.s32.totalorder %s2907_s30, 1 }
 0x11d   : > { %v2926_v54 = vmov (!%p2709_p11), 0  }
 0x11e   : > { %863 = sbr.rel (%p2709_p11) target bundleno = 293 (0x125), region = 64  ;;  %865 = vst.msk [vmem:[#allocation2 + $0xe0] sm:$0xff] (!%p2709_p11), %vm778_vm8, %v2926_v54 }
 0x125 PF: > { %v2882_v19 = vld [vmem:[%s3819_s7] sm:$0xff]   ;;  %v966_v20 = vlaneseq  ;;  %v2883_v21 = vld [vmem:[%s3819_s7 + $0x8] ss:$0 sps:$4 sm:$0xff]   ;;  %vm901_vm9 = vcmask 1043456   ;;  %vm1046_vm10 = vcmask 1046528   ;;  %vm1187_vm11 = vcmask 1045504  }
 0x126   : > { %2808 = vmatprep.subr.bf16.mxu1 %v2882_v19  ;;  %v866_v22 = vld [vmem:[%s3817_s5] sm:$0x7]  ;;  %v869_v23 = vld [vmem:[#allocation2] sm:$0x80]  ;;  %v2347_v24 = vsel %vm901_vm9, %v2883_v21, 0  ;;  %v870_v25 = vld [vmem:[#allocation2 + $0x8] sm:$0xff] }
 0x127   : > { %2809 = vmatpush3.bf16.msra.mxu1 %v2882_v19  ;;  %v902_v26 = vrot.slane %v869_v23, 4  ;;  %v967_v27 = vshrl.u32 %v966_v20, 7  ;;  %v1278_v28 = vld [vmem:[#allocation2 + $0x20] sm:$0xff]  ;;  %v903_v29 = vrot.slane %v870_v25, 4  ;;  %v994_v30 = vunpack.c.l.bf16 %v870_v25  ;;  %v1119_v32 = vld [vmem:[#allocation2 + $0x10] sm:$0x1] }
 0x128   : > { %2829 = vmatprep.subr.msk.bf16.mxu1 %vm901_vm9, %v2883_v21  ;;  %v995_v31 = vunpack.c.h.bf16 %v870_v25  ;;  %v1277_v33 = vld [vmem:[#allocation2 + $0x18] sm:$0x80]  ;;  %v867_v34 = vld [vmem:[%s3817_s5 + $0x4] sm:$0x7]  ;;  %v1127_v37 = vunpack.c.l.bf16 %v1119_v32  ;;  %v3157_v42 = vrot.slane %v1278_v28, 4  ;;  %v3187_v7 = vunpack.c.l.bf16 %v1278_v28 }
 0x129   : > { %v3150_v35 = vsub.s32 0, %v967_v27  ;;  %v3152_v36 = vsub.s32 1, %v967_v27  ;;  %v3154_v38 = vsub.s32 2, %v967_v27  ;;  %v904_v39 = vsel %vm901_vm9, %v902_v26, %v903_v29  ;;  %v1549_v8 = vld [vmem:[#allocation2 + $0x28] sm:$0x1]  ;;  %v1707_v20 = vld [vmem:[#allocation2 + $0x38] sm:$0xff] }
 0x12a   : > { %v944_v40 = vunpack.c.l.bf16 %v903_v29  ;;  %v1309_v41 = vrot.slane %v1277_v33, 4  ;;  %v942_v43 = vunpack.c.l.bf16 %v904_v39  ;;  %v943_v44 = vunpack.c.h.bf16 %v904_v39  ;;  %v1706_v9 = vld [vmem:[#allocation2 + $0x30] sm:$0x80] }
 0x12b   : > { %2811 = vmatpush3.bf16.msra.mxu1 %v2347_v24  ;;  %v3160_v45 = vrot.slane %v866_v22, %v3150_v35  ;;  %v3163_v46 = vrot.slane %v866_v22, %v3152_v36  ;;  %v3166_v47 = vrot.slane %v866_v22, %v3154_v38  ;;  %v1351_v49 = vunpack.c.l.bf16 %v3157_v42  ;;  %v868_v22 = vld [vmem:[%s3817_s5 + $0x8] sm:$0x7] }
 0x12c   : > { %v1311_v48 = vsel %vm901_vm9, %v1309_v41, %v3157_v42  ;;  %v3172_v50 = vrot.slane %v867_v34, %v3150_v35  ;;  %v3192_v16 = vunpack.c.h.bf16 %v1278_v28  ;;  %v3195_v17 = vrot.slane %v867_v34, %v3152_v36 }
 0x12d   : > { %v970_v51 = vmul.f32 %v3160_v45, %v942_v43  ;;  %v971_v52 = vmul.f32 %v3160_v45, %v943_v44  ;;  %v972_v53 = vmul.f32 %v3160_v45, %v944_v40  ;;  %v1014_v55 = vmul.f32 %v3163_v46, %v994_v30 }
 0x12e   : > { %v1015_v56 = vmul.f32 %v3163_v46, %v995_v31  ;;  %v1139_v57 = vmul.f32 %v3166_v47, %v994_v30  ;;  %v1140_v58 = vmul.f32 %v3166_v47, %v995_v31  ;;  %v1141_v59 = vmul.f32 %v3166_v47, %v1127_v37 }
 0x12f   : > { %v1047_v60 = vrot.slane %v1014_v55, 1  ;;  %v1349_v61 = vunpack.c.l.bf16 %v1311_v48  ;;  %v1350_v62 = vunpack.c.h.bf16 %v1311_v48  ;;  %v1379_v63 = vmul.f32 %v3172_v50, %v1351_v49 }
 0x130   : > { %v1048_v0 = vrot.slane %v1015_v56, 1  ;;  %v1188_v1 = vrot.slane %v1139_v57, 2  ;;  %v1189_v2 = vrot.slane %v1140_v58, 2  ;;  %v1191_v3 = vrot.slane %v1141_v59, 2  ;;  %v1978_v57 = vld [vmem:[#allocation2 + $0x40] sm:$0x1] }
 0x131   : > { %v1095_v4 = vadd.f32 %v1047_v60, %v970_v51  ;;  %v1377_v5 = vmul.f32 %v3172_v50, %v1349_v61  ;;  %v1378_v6 = vmul.f32 %v3172_v50, %v1350_v62  ;;  %v1557_v54 = vunpack.c.l.bf16 %v1549_v8  ;;  %v871_v61 = vld [vmem:[#allocation2 + $0x18] sm:$0x80] }
 0x132   : > { %v1049_v10 = vsel %vm1046_vm10, %v1047_v60, %v1048_v0  ;;  %v1097_v11 = vadd.f32 %v1048_v0, %v972_v53  ;;  %v1190_v12 = vsel %vm1187_vm11, %v1188_v1, %v1189_v2  ;;  %v1192_v13 = vsel %vm1187_vm11, %v1189_v2, %v1191_v3 }
 0x133   : > { %v1096_v14 = vadd.f32 %v1049_v10, %v971_v52  ;;  %v1252_v15 = vadd.f32 %v1188_v1, %v1095_v4  ;;  %v3198_v19 = vrot.slane %v867_v34, %v3154_v38  ;;  %v1738_v21 = vrot.slane %v1706_v9, 4 }
 0x134   : > { %v1254_v18 = vadd.f32 %v1192_v13, %v1097_v11  ;;  %v1445_v25 = vmul.f32 %v3195_v17, %v3187_v7  ;;  %v1446_v26 = vmul.f32 %v3195_v17, %v3192_v16  ;;  %v3212_v34 = vrot.slane %v1707_v20, 4 }
 0x135   : > { %v1253_v23 = vadd.f32 %v1190_v12, %v1096_v14  ;;  %v1401_v24 = vadd.f32 %v1377_v5, %v1252_v15  ;;  %v1569_v28 = vmul.f32 %v3198_v19, %v3187_v7  ;;  %v1570_v29 = vmul.f32 %v3198_v19, %v3192_v16 }
 0x136   : > { %v1403_v27 = vadd.f32 %v1379_v63, %v1254_v18  ;;  %v1571_v30 = vmul.f32 %v3198_v19, %v1557_v54  ;;  %v1477_v32 = vrot.slane %v1445_v25, 1  ;;  %v1478_v33 = vrot.slane %v1446_v26, 1 }
 0x137   : > { %v1402_v31 = vadd.f32 %v1378_v6, %v1253_v23  ;;  %v1617_v37 = vrot.slane %v1569_v28, 2  ;;  %v1618_v39 = vrot.slane %v1570_v29, 2  ;;  %v3215_v41 = vrot.slane %v868_v22, %v3150_v35 }
 0x138   : > { %v1620_v40 = vrot.slane %v1571_v30, 2  ;;  %v1479_v43 = vsel %vm1046_vm10, %v1477_v32, %v1478_v33  ;;  %v1525_v44 = vadd.f32 %v1477_v32, %v1401_v24  ;;  %v1527_v48 = vadd.f32 %v1478_v33, %v1403_v27  ;;  %v1120_v30 = vld [vmem:[#allocation2 + $0x28] sm:$0x1] }
 0x139   : > { %v1740_v51 = vsel %vm901_vm9, %v1738_v21, %v3212_v34  ;;  %v1526_v52 = vadd.f32 %v1479_v43, %v1402_v31  ;;  %v1619_v53 = vsel %vm1187_vm11, %v1617_v37, %v1618_v39  ;;  %v3223_v35 = vunpack.c.l.bf16 %v3212_v34 }
 0x13a   : > { %v1621_v55 = vsel %vm1187_vm11, %v1618_v39, %v1620_v40  ;;  %v1778_v56 = vunpack.c.l.bf16 %v1740_v51  ;;  %v1681_v58 = vadd.f32 %v1617_v37, %v1525_v44  ;;  %v1779_v60 = vunpack.c.h.bf16 %v1740_v51  ;;  %v3260_v37 = vld [vmem:[%s3818_s6] ss:$0 sm:$0xff] }
 0x13b   : > { %v1683_v59 = vadd.f32 %v1621_v55, %v1527_v48  ;;  %v1682_v62 = vadd.f32 %v1619_v53, %v1526_v52  ;;  %v3226_v0 = vunpack.c.l.bf16 %v1707_v20  ;;  %v3228_v1 = vunpack.c.h.bf16 %v1707_v20 }
 0x13c   : > { %v1806_v63 = vmul.f32 %v3215_v41, %v1778_v56  ;;  %v1807_v2 = vmul.f32 %v3215_v41, %v1779_v60  ;;  %v1808_v3 = vmul.f32 %v3215_v41, %v3223_v35  ;;  %v3234_v4 = vrot.slane %v868_v22, %v3152_v36 }
 0x13d   : > { %v1986_v5 = vunpack.c.l.bf16 %v1978_v57  ;;  %v3237_v8 = vrot.slane %v868_v22, %v3154_v38  ;;  %v905_v9 = vrot.slane %v871_v61, 4  ;;  %v975_v25 = vmul.f32 %v1351_v49, %v3160_v45 }
 0x13e   : > { %v1830_v6 = vadd.f32 %v1806_v63, %v1681_v58  ;;  %v1831_v10 = vadd.f32 %v1807_v2, %v1682_v62  ;;  %v1832_v11 = vadd.f32 %v1808_v3, %v1683_v59  ;;  %v1874_v12 = vmul.f32 %v3234_v4, %v3226_v0  ;;  %v1279_v3 = vld [vmem:[#allocation2 + $0x30] sm:$0x80] }
 0x13f   : > { %v1875_v13 = vmul.f32 %v3234_v4, %v3228_v1  ;;  %v1998_v14 = vmul.f32 %v3237_v8, %v3226_v0  ;;  %v1999_v36 = vmul.f32 %v3237_v8, %v3228_v1  ;;  %v2000_v15 = vmul.f32 %v3237_v8, %v1986_v5 }
 0x140   : > { %v907_v38 = vsel %vm901_vm9, %v905_v9, %v3157_v42  ;;  %v1906_v18 = vrot.slane %v1874_v12, 1  ;;  %vm2237_vm12 = vcmask 1040384   ;;  %v1016_v40 = vmul.f32 %v3187_v7, %v3163_v46 }
 0x141   : > { %v1907_v54 = vrot.slane %v1875_v13, 1  ;;  %v945_v20 = vunpack.c.l.bf16 %v907_v38  ;;  %v946_v21 = vunpack.c.h.bf16 %v907_v38  ;;  %v2046_v22 = vrot.slane %v1998_v14, 2 }
 0x142   : > { %v2047_v23 = vrot.slane %v1999_v36, 2  ;;  %v2049_v24 = vrot.slane %v2000_v15, 2  ;;  %v1954_v27 = vadd.f32 %v1906_v18, %v1830_v6  ;;  %v1017_v43 = vmul.f32 %v3192_v16, %v3163_v46 }
 0x143   : > { %v1908_v26 = vsel %vm1046_vm10, %v1906_v18, %v1907_v54  ;;  %v1956_v28 = vadd.f32 %v1907_v54, %v1832_v11  ;;  %v973_v29 = vmul.f32 %v3160_v45, %v945_v20  ;;  %v974_v42 = vmul.f32 %v3160_v45, %v946_v21  ;;  %v1550_v18 = vld [vmem:[#allocation2 + $0x40] sm:$0x1] }
 0x144   : > { %v1955_v31 = vadd.f32 %v1908_v26, %v1831_v10  ;;  %v2048_v32 = vsel %vm1187_vm11, %v2046_v22, %v2047_v23  ;;  %v2050_v33 = vsel %vm1187_vm11, %v2047_v23, %v2049_v24  ;;  %v2110_v49 = vadd.f32 %v2046_v22, %v1954_v27 }
 0x145   : > { %v2112_v39 = vadd.f32 %v2050_v33, %v1956_v28  ;;  %v1128_v48 = vunpack.c.l.bf16 %v1120_v30  ;;  %v1142_v51 = vmul.f32 %v3187_v7, %v3166_v47  ;;  %v1143_v52 = vmul.f32 %v3192_v16, %v3166_v47 }
 0x146   : > { %v2111_v44 = vadd.f32 %v2048_v32, %v1955_v31  ;;  %v2141_v53 = vadd.f32 %v3260_v37, %v2110_v49  ;;  %v1050_v56 = vrot.slane %v1016_v40, 1  ;;  %v1051_v57 = vrot.slane %v1017_v43, 1  ;;  %v1708_v49 = vld [vmem:[#allocation2 + $0x48] sm:$0x80] }
 0x147   : > { %v2143_v55 = vadd.f32 %v3260_v37, %v2112_v39  ;;  %v1144_v59 = vmul.f32 %v3166_v47, %v1128_v48  ;;  %v1193_v60 = vrot.slane %v1142_v51, 2  ;;  %v1194_v61 = vrot.slane %v1143_v52, 2  ;;  %v1709_v48 = vld [vmem:[#allocation2 + $0x50] sm:$0xff] }
 0x148   : > { %v2142_v58 = vadd.f32 %v3260_v37, %v2111_v44  ;;  %v2165_v62 = vmax.f32 %v2141_v53, 0.0  ;;  %v1052_v2 = vsel %vm1046_vm10, %v1050_v56, %v1051_v57  ;;  %v1098_v7 = vadd.f32 %v1050_v56, %v973_v29  ;;  %v1979_v56 = vld [vmem:[#allocation2 + $0x58] sm:$0x1] }
 0x149   : > { %v2167_v63 = vmax.f32 %v2143_v55, 0.0  ;;  %v1099_v16 = vadd.f32 %v1052_v2, %v974_v42  ;;  %v1100_v6 = vadd.f32 %v1051_v57, %v975_v25  ;;  %v1195_v9 = vsel %vm1187_vm11, %v1193_v60, %v1194_v61 }
 0x14a   : > { %v2166_v5 = vmax.f32 %v2142_v58, 0.0  ;;  %v2189_v10 = vmin.f32 %v2165_v62, 6.0  ;;  %v1196_v12 = vrot.slane %v1144_v59, 2  ;;  %v1255_v13 = vadd.f32 %v1193_v60, %v1098_v7 }
 0x14b   : > { %v2191_v11 = vmin.f32 %v2167_v63, 6.0  ;;  %v1256_v36 = vadd.f32 %v1195_v9, %v1099_v16  ;;  %v1312_v15 = vrot.slane %v1279_v3, 4  ;;  %v1382_v38 = vmul.f32 %v3223_v35, %v3172_v50 }
 0x14c   : > { %v2190_v14 = vmin.f32 %v2166_v5, 6.0  ;;  %v2238_v54 = vrot.slane %v2189_v10, 7  ;;  %v1197_v21 = vsel %vm1187_vm11, %v1194_v61, %v1196_v12  ;;  %v1447_v22 = vmul.f32 %v3226_v0, %v3195_v17 }
 0x14d   : > { %v2241_v20 = vrot.slane %v2191_v11, 7  ;;  %v1257_v24 = vadd.f32 %v1197_v21, %v1100_v6  ;;  %v1314_v25 = vsel %vm901_vm9, %v1312_v15, %v3212_v34  ;;  %v1448_v26 = vmul.f32 %v3228_v1, %v3195_v17 }
 0x14e   : > { %v2239_v23 = vrot.slane %v2190_v14, 7  ;;  %v1352_v27 = vunpack.c.l.bf16 %v1314_v25  ;;  %v1353_v28 = vunpack.c.h.bf16 %v1314_v25  ;;  %v1480_v29 = vrot.slane %v1447_v22, 1 }
 0x14f   : > { %v1558_v30 = vunpack.c.l.bf16 %v1550_v18  ;;  %v1406_v33 = vadd.f32 %v1382_v38, %v1257_v24  ;;  %v1481_v42 = vrot.slane %v1448_v26, 1  ;;  %v1572_v44 = vmul.f32 %v3226_v0, %v3198_v19  ;;  %v873_v24 = vld [vmem:[#allocation2 + $0x30] sm:$0x80] }
 0x150   : > { %v2240_v31 = vsel %vm2237_vm12, %v2238_v54, %v2239_v23  ;;  %v2242_v32 = vsel %vm2237_vm12, %v2239_v23, %v2241_v20  ;;  %v1380_v40 = vmul.f32 %v3172_v50, %v1352_v27  ;;  %v1381_v43 = vmul.f32 %v3172_v50, %v1353_v28 }
 0x151   : > { %v2294_v39 = vpack.c.bf16 %v2242_v32, %v2240_v31  ;;  %v1482_v51 = vsel %vm1046_vm10, %v1480_v29, %v1481_v42  ;;  %v1530_v52 = vadd.f32 %v1481_v42, %v1406_v33  ;;  %v1573_v53 = vmul.f32 %v3228_v1, %v3198_v19 }
 0x152   : > { %v1574_v55 = vmul.f32 %v3198_v19, %v1558_v30  ;;  %v1404_v57 = vadd.f32 %v1380_v40, %v1255_v13  ;;  %v1405_v58 = vadd.f32 %v1381_v43, %v1256_v36  ;;  %v1622_v59 = vrot.slane %v1572_v44, 2 }
 0x153   : > { %2812 = vmatprep.mubr.msk.bf16.mxu1 %vm778_vm8, %v2294_v39  ;;  %v1741_v60 = vrot.slane %v1708_v49, 4  ;;  %v1623_v61 = vrot.slane %v1573_v53, 2  ;;  %v3297_v63 = vrot.slane %v1709_v48, 4  ;;  %v3299_v2 = vunpack.c.l.bf16 %v1709_v48 }
 0x154   : > { %v1625_v62 = vrot.slane %v1574_v55, 2  ;;  %v1528_v7 = vadd.f32 %v1480_v29, %v1404_v57  ;;  %v1529_v3 = vadd.f32 %v1482_v51, %v1405_v58  ;;  %v3301_v5 = vunpack.c.h.bf16 %v1709_v48  ;;  %v1121_v51 = vld [vmem:[#allocation2 + $0x40] sm:$0x1] }
 0x155   : > { %v1987_v16 = vunpack.c.l.bf16 %v1979_v56  ;;  %v1624_v6 = vsel %vm1187_vm11, %v1622_v59, %v1623_v61  ;;  %v1743_v10 = vsel %vm901_vm9, %v1741_v60, %v3297_v63  ;;  %v3308_v11 = vunpack.c.l.bf16 %v3297_v63 }
 0x156   : > { %v1626_v9 = vsel %vm1187_vm11, %v1623_v61, %v1625_v62  ;;  %v1684_v12 = vadd.f32 %v1622_v59, %v1528_v7  ;;  %v1685_v13 = vadd.f32 %v1624_v6, %v1529_v3  ;;  %v1781_v36 = vunpack.c.l.bf16 %v1743_v10 }
 0x157   : > { %v1686_v14 = vadd.f32 %v1626_v9, %v1530_v52  ;;  %v1782_v15 = vunpack.c.h.bf16 %v1743_v10  ;;  %v1811_v38 = vmul.f32 %v3215_v41, %v3308_v11  ;;  %v1876_v18 = vmul.f32 %v3234_v4, %v3299_v2 }
 0x158   : > { %v1877_v54 = vmul.f32 %v3234_v4, %v3301_v5  ;;  %v1809_v20 = vmul.f32 %v3215_v41, %v1781_v36  ;;  %v2001_v21 = vmul.f32 %v3237_v8, %v3299_v2  ;;  %v2002_v22 = vmul.f32 %v3237_v8, %v3301_v5 }
 0x159   : > { %v2003_v23 = vmul.f32 %v3237_v8, %v1987_v16  ;;  %v1810_v25 = vmul.f32 %v3215_v41, %v1782_v15  ;;  %v1835_v26 = vadd.f32 %v1811_v38, %v1686_v14  ;;  %v1909_v27 = vrot.slane %v1876_v18, 1  ;;  %v1281_v14 = vld [vmem:[#allocation2 + $0x48] sm:$0x80] }
 0x15a   : > { %v1910_v28 = vrot.slane %v1877_v54, 1  ;;  %v1833_v29 = vadd.f32 %v1809_v20, %v1684_v12  ;;  %v2051_v30 = vrot.slane %v2001_v21, 2  ;;  %v2052_v31 = vrot.slane %v2002_v22, 2 }
 0x15b   : > { %v2054_v32 = vrot.slane %v2003_v23, 2  ;;  %v1834_v33 = vadd.f32 %v1810_v25, %v1685_v13  ;;  %v908_v39 = vrot.slane %v873_v24, 4  ;;  %v978_v48 = vmul.f32 %v3223_v35, %v3160_v45 }
 0x15c   : > { %v1911_v42 = vsel %vm1046_vm10, %v1909_v27, %v1910_v28  ;;  %v1959_v49 = vadd.f32 %v1910_v28, %v1835_v26  ;;  %v1957_v40 = vadd.f32 %v1909_v27, %v1833_v29  ;;  %v2053_v43 = vsel %vm1187_vm11, %v2051_v30, %v2052_v31 }
 0x15d   : > { %v2055_v44 = vsel %vm1187_vm11, %v2052_v31, %v2054_v32  ;;  %v1958_v52 = vadd.f32 %v1911_v42, %v1834_v33  ;;  %v910_v55 = vsel %vm901_vm9, %v908_v39, %v3212_v34  ;;  %v1018_v56 = vmul.f32 %v3226_v0, %v3163_v46  ;;  %v1551_v33 = vld [vmem:[#allocation2 + $0x58] sm:$0x1] }
 0x15e   : > { %v2115_v53 = vadd.f32 %v2055_v44, %v1959_v49  ;;  %v2113_v57 = vadd.f32 %v2051_v30, %v1957_v40  ;;  %v948_v58 = vunpack.c.l.bf16 %v910_v55  ;;  %v949_v59 = vunpack.c.h.bf16 %v910_v55 }
 0x15f   : > { %v1019_v60 = vmul.f32 %v3228_v1, %v3163_v46  ;;  %v2114_v61 = vadd.f32 %v2053_v43, %v1958_v52  ;;  %v1053_v7 = vrot.slane %v1018_v56, 1  ;;  %v1129_v35 = vunpack.c.l.bf16 %v1121_v51 }
 0x160   : > { %v2146_v62 = vadd.f32 %v3260_v37, %v2115_v53  ;;  %v2144_v3 = vadd.f32 %v3260_v37, %v2113_v57  ;;  %v976_v16 = vmul.f32 %v3160_v45, %v948_v58  ;;  %v977_v34 = vmul.f32 %v3160_v45, %v949_v59  ;;  %v1710_v57 = vld [vmem:[#allocation2 + $0x60] sm:$0x80]  ;;  %v1711_v58 = vld [vmem:[#allocation2 + $0x68] sm:$0xff] }
 0x161   : > { %v1054_v6 = vrot.slane %v1019_v60, 1  ;;  %v2145_v9 = vadd.f32 %v3260_v37, %v2114_v61  ;;  %v1145_v12 = vmul.f32 %v3226_v0, %v3166_v47  ;;  %v1146_v13 = vmul.f32 %v3228_v1, %v3166_v47 }
 0x162   : > { %v2170_v10 = vmax.f32 %v2146_v62, 0.0  ;;  %v2168_v36 = vmax.f32 %v2144_v3, 0.0  ;;  %v1101_v38 = vadd.f32 %v1053_v7, %v976_v16  ;;  %v1147_v22 = vmul.f32 %v3166_v47, %v1129_v35 }
 0x163   : > { %v1055_v15 = vsel %vm1046_vm10, %v1053_v7, %v1054_v6  ;;  %v1103_v18 = vadd.f32 %v1054_v6, %v978_v48  ;;  %v2169_v54 = vmax.f32 %v2145_v9, 0.0  ;;  %v1198_v24 = vrot.slane %v1145_v12, 2 }
 0x164   : > { %v2194_v20 = vmin.f32 %v2170_v10, 6.0  ;;  %v1102_v21 = vadd.f32 %v1055_v15, %v977_v34  ;;  %v2192_v23 = vmin.f32 %v2168_v36, 6.0  ;;  %v1199_v25 = vrot.slane %v1146_v13, 2 }
 0x165   : > { %v1315_v26 = vrot.slane %v1281_v14, 4  ;;  %v2193_v27 = vmin.f32 %v2169_v54, 6.0  ;;  %v1201_v28 = vrot.slane %v1147_v22, 2  ;;  %v1385_v1 = vmul.f32 %v3308_v11, %v3172_v50 }
 0x166   : > { %v2246_v0 = vrot.slane %v2194_v20, 7  ;;  %v2243_v29 = vrot.slane %v2192_v23, 7  ;;  %v1200_v30 = vsel %vm1187_vm11, %v1198_v24, %v1199_v25  ;;  %v1258_v31 = vadd.f32 %v1198_v24, %v1101_v38  ;;  %v1980_v24 = vld [vmem:[#allocation2 + $0x70] sm:$0x1] }
 0x167   : > { %v1317_v32 = vsel %vm901_vm9, %v1315_v26, %v3297_v63  ;;  %v2244_v42 = vrot.slane %v2193_v27, 7  ;;  %v1202_v49 = vsel %vm1187_vm11, %v1199_v25, %v1201_v28  ;;  %v1259_v39 = vadd.f32 %v1200_v30, %v1102_v21 }
 0x168   : > { %v1355_v40 = vunpack.c.l.bf16 %v1317_v32  ;;  %v1260_v43 = vadd.f32 %v1202_v49, %v1103_v18  ;;  %v1356_v44 = vunpack.c.h.bf16 %v1317_v32  ;;  %v1449_v48 = vmul.f32 %v3299_v2, %v3195_v17  ;;  %v875_v49 = vld [vmem:[#allocation2 + $0x48] sm:$0x80] }
 0x169   : > { %v1450_v51 = vmul.f32 %v3301_v5, %v3195_v17  ;;  %v2245_v52 = vsel %vm2237_vm12, %v2243_v29, %v2244_v42  ;;  %v2247_v53 = vsel %vm2237_vm12, %v2244_v42, %v2246_v0  ;;  %v1559_v56 = vunpack.c.l.bf16 %v1551_v33 }
 0x16a   : > { %v1383_v55 = vmul.f32 %v3172_v50, %v1355_v40  ;;  %v2295_v59 = vpack.c.bf16 %v2247_v53, %v2245_v52  ;;  %v1384_v60 = vmul.f32 %v3172_v50, %v1356_v44  ;;  %v1409_v61 = vadd.f32 %v1385_v1, %v1260_v43 }
 0x16b   : > { %v1483_v62 = vrot.slane %v1449_v48, 1  ;;  %v1484_v35 = vrot.slane %v1450_v51, 1  ;;  %v1575_v3 = vmul.f32 %v3299_v2, %v3198_v19  ;;  %v1576_v16 = vmul.f32 %v3301_v5, %v3198_v19 }
 0x16c   : > { %v1407_v7 = vadd.f32 %v1383_v55, %v1258_v31  ;;  %2813 = vmatmul.mubr.msk.bf16.vlgmr.msra.gmra.mrb[0].mxu1 %vm778_vm8, %v2295_v59  ;;  %v1408_v34 = vadd.f32 %v1384_v60, %v1259_v39  ;;  %v1577_v6 = vmul.f32 %v3198_v19, %v1559_v56  ;;  %v1744_v9 = vrot.slane %v1710_v57, 4 }
 0x16d   : > { %v3365_v10 = vrot.slane %v1711_v58, 4  ;;  %v1485_v12 = vsel %vm1046_vm10, %v1483_v62, %v1484_v35  ;;  %v1533_v14 = vadd.f32 %v1484_v35, %v1409_v61  ;;  %v1627_v36 = vrot.slane %v1575_v3, 2 }
 0x16e   : > { %v1531_v13 = vadd.f32 %v1483_v62, %v1407_v7  ;;  %v1532_v15 = vadd.f32 %v1485_v12, %v1408_v34  ;;  %v1628_v38 = vrot.slane %v1576_v16, 2  ;;  %v1630_v18 = vrot.slane %v1577_v6, 2  ;;  %v1122_v34 = vld [vmem:[#allocation2 + $0x58] sm:$0x1] }
 0x16f   : > { %v1746_v54 = vsel %vm901_vm9, %v1744_v9, %v3365_v10  ;;  %v3371_v23 = vunpack.c.l.bf16 %v3365_v10  ;;  %v3375_v27 = vunpack.c.l.bf16 %v1711_v58  ;;  %v3377_v0 = vunpack.c.h.bf16 %v1711_v58 }
 0x170   : > { %v1687_v20 = vadd.f32 %v1627_v36, %v1531_v13  ;;  %v1784_v21 = vunpack.c.l.bf16 %v1746_v54  ;;  %v1785_v22 = vunpack.c.h.bf16 %v1746_v54  ;;  %v1629_v25 = vsel %vm1187_vm11, %v1627_v36, %v1628_v38 }
 0x171   : > { %v1631_v26 = vsel %vm1187_vm11, %v1628_v38, %v1630_v18  ;;  %v1688_v28 = vadd.f32 %v1629_v25, %v1532_v15  ;;  %v1814_v31 = vmul.f32 %v3215_v41, %v3371_v23  ;;  %v1878_v32 = vmul.f32 %v3234_v4, %v3375_v27 }
 0x172   : > { %v1689_v1 = vadd.f32 %v1631_v26, %v1533_v14  ;;  %v1812_v29 = vmul.f32 %v3215_v41, %v1784_v21  ;;  %v1813_v30 = vmul.f32 %v3215_v41, %v1785_v22  ;;  %v1879_v33 = vmul.f32 %v3234_v4, %v3377_v0 }
 0x173   : > { %v1988_v42 = vunpack.c.l.bf16 %v1980_v24  ;;  %v2004_v43 = vmul.f32 %v3237_v8, %v3375_v27  ;;  %v2005_v44 = vmul.f32 %v3237_v8, %v3377_v0  ;;  %v1912_v51 = vrot.slane %v1878_v32, 1 }
 0x174   : > { %v1836_v39 = vadd.f32 %v1812_v29, %v1687_v20  ;;  %v1837_v40 = vadd.f32 %v1813_v30, %v1688_v28  ;;  %v1838_v48 = vadd.f32 %v1814_v31, %v1689_v1  ;;  %v1913_v52 = vrot.slane %v1879_v33, 1  ;;  %v1283_v29 = vld [vmem:[#allocation2 + $0x60] sm:$0x80] }
 0x175   : > { %v2006_v53 = vmul.f32 %v3237_v8, %v1988_v42  ;;  %v2056_v55 = vrot.slane %v2004_v43, 2  ;;  %v2057_v56 = vrot.slane %v2005_v44, 2  ;;  %v911_v57 = vrot.slane %v875_v49, 4 }
 0x176   : > { %v981_v58 = vmul.f32 %v3308_v11, %v3160_v45  ;;  %v1914_v59 = vsel %vm1046_vm10, %v1912_v51, %v1913_v52  ;;  %v1960_v60 = vadd.f32 %v1912_v51, %v1836_v39  ;;  %v1962_v61 = vadd.f32 %v1913_v52, %v1838_v48 }
 0x177   : > { %v2059_v62 = vrot.slane %v2006_v53, 2  ;;  %v1961_v7 = vadd.f32 %v1914_v59, %v1837_v40  ;;  %v2058_v35 = vsel %vm1187_vm11, %v2056_v55, %v2057_v56  ;;  %v913_v3 = vsel %vm901_vm9, %v911_v57, %v3297_v63 }
 0x178   : > { %v1020_v16 = vmul.f32 %v3299_v2, %v3163_v46  ;;  %v2116_v9 = vadd.f32 %v2056_v55, %v1960_v60  ;;  %v951_v12 = vunpack.c.l.bf16 %v913_v3  ;;  %v952_v11 = vunpack.c.h.bf16 %v913_v3 }
 0x179   : > { %v2060_v6 = vsel %vm1187_vm11, %v2057_v56, %v2059_v62  ;;  %v2117_v13 = vadd.f32 %v2058_v35, %v1961_v7  ;;  %v1021_v36 = vmul.f32 %v3301_v5, %v3163_v46  ;;  %v1130_v54 = vunpack.c.l.bf16 %v1122_v34  ;;  %v1552_v7 = vld [vmem:[#allocation2 + $0x70] sm:$0x1] }
 0x17a   : > { %v2118_v14 = vadd.f32 %v2060_v6, %v1962_v61  ;;  %v1056_v15 = vrot.slane %v1020_v16, 1  ;;  %v2147_v38 = vadd.f32 %v3260_v37, %v2116_v9  ;;  %v979_v18 = vmul.f32 %v3160_v45, %v951_v12  ;;  %v1712_v6 = vld [vmem:[#allocation2 + $0x78] sm:$0x80] }
 0x17b   : > { %v980_v63 = vmul.f32 %v3160_v45, %v952_v11  ;;  %v2148_v20 = vadd.f32 %v3260_v37, %v2117_v13  ;;  %v1057_v22 = vrot.slane %v1021_v36, 1  ;;  %v1148_v24 = vmul.f32 %v3299_v2, %v3166_v47 }
 0x17c   : > { %v2149_v21 = vadd.f32 %v3260_v37, %v2118_v14  ;;  %v2171_v25 = vmax.f32 %v2147_v38, 0.0  ;;  %v1104_v26 = vadd.f32 %v1056_v15, %v979_v18  ;;  %v1149_v28 = vmul.f32 %v3301_v5, %v3166_v47  ;;  %v1713_v18 = vld [vmem:[#allocation2 + $0x80] sm:$0xff] }
 0x17d   : > { %v1150_v1 = vmul.f32 %v3166_v47, %v1130_v54  ;;  %v2172_v30 = vmax.f32 %v2148_v20, 0.0  ;;  %v1058_v32 = vsel %vm1046_vm10, %v1056_v15, %v1057_v22  ;;  %v1106_v33 = vadd.f32 %v1057_v22, %v981_v58  ;;  %v1981_v22 = vld [vmem:[#allocation2 + $0x88] sm:$0x1] }
 0x17e   : > { %v2173_v31 = vmax.f32 %v2149_v21, 0.0  ;;  %v2195_v42 = vmin.f32 %v2171_v25, 6.0  ;;  %v1105_v49 = vadd.f32 %v1058_v32, %v980_v63  ;;  %v1203_v39 = vrot.slane %v1148_v24, 2 }
 0x17f   : > { %v1204_v40 = vrot.slane %v1149_v28, 2  ;;  %v2196_v43 = vmin.f32 %v2172_v30, 6.0  ;;  %v1206_v2 = vrot.slane %v1150_v1, 2  ;;  %v1318_v48 = vrot.slane %v1283_v29, 4 }
 0x180   : > { %v2197_v44 = vmin.f32 %v2173_v31, 6.0  ;;  %v2248_v51 = vrot.slane %v2195_v42, 7  ;;  %v1261_v5 = vadd.f32 %v1203_v39, %v1104_v26  ;;  %v1388_v53 = vmul.f32 %v3371_v23, %v3172_v50 }
 0x181   : > { %v1205_v52 = vsel %vm1187_vm11, %v1203_v39, %v1204_v40  ;;  %v2249_v55 = vrot.slane %v2196_v43, 7  ;;  %v1207_v57 = vsel %vm1187_vm11, %v1204_v40, %v1206_v2  ;;  %v1320_v60 = vsel %vm901_vm9, %v1318_v48, %v3365_v10 }
 0x182   : > { %v2251_v56 = vrot.slane %v2197_v44, 7  ;;  %v1262_v58 = vadd.f32 %v1205_v52, %v1105_v49  ;;  %v1263_v59 = vadd.f32 %v1207_v57, %v1106_v33  ;;  %v1451_v61 = vmul.f32 %v3375_v27, %v3195_v17  ;;  %v877_v57 = vld [vmem:[#allocation2 + $0x60] sm:$0x80] }
 0x183   : > { %v1452_v62 = vmul.f32 %v3377_v0, %v3195_v17  ;;  %v2250_v35 = vsel %vm2237_vm12, %v2248_v51, %v2249_v55  ;;  %v1358_v16 = vunpack.c.l.bf16 %v1320_v60  ;;  %v1359_v34 = vunpack.c.h.bf16 %v1320_v60 }
 0x184   : > { %v2252_v3 = vsel %vm2237_vm12, %v2249_v55, %v2251_v56  ;;  %v1412_v12 = vadd.f32 %v1388_v53, %v1263_v59  ;;  %v1486_v11 = vrot.slane %v1451_v61, 1  ;;  %v1560_v15 = vunpack.c.l.bf16 %v1552_v7 }
 0x185   : > { %v2296_v9 = vpack.c.bf16 %v2252_v3, %v2250_v35  ;;  %v1487_v13 = vrot.slane %v1452_v62, 1  ;;  %v1386_v14 = vmul.f32 %v3172_v50, %v1358_v16  ;;  %v1387_v36 = vmul.f32 %v3172_v50, %v1359_v34 }
 0x186   : > { %v1578_v38 = vmul.f32 %v3375_v27, %v3198_v19  ;;  %v1579_v20 = vmul.f32 %v3377_v0, %v3198_v19  ;;  %v1747_v21 = vrot.slane %v1712_v6, 4  ;;  %v1580_v26 = vmul.f32 %v3198_v19, %v1560_v15 }
 0x187   : > { %2816 = vmatprep.mubr.msk.bf16.mxu1 %vm778_vm8, %v2296_v9  ;;  %v1488_v63 = vsel %vm1046_vm10, %v1486_v11, %v1487_v13  ;;  %v1536_v54 = vadd.f32 %v1487_v13, %v1412_v12  ;;  %v1410_v24 = vadd.f32 %v1386_v14, %v1261_v5  ;;  %v1411_v25 = vadd.f32 %v1387_v36, %v1262_v58 }
 0x188   : > { %v1632_v28 = vrot.slane %v1578_v38, 2  ;;  %v1633_v1 = vrot.slane %v1579_v20, 2  ;;  %v3435_v29 = vrot.slane %v1713_v18, 4  ;;  %v3437_v30 = vunpack.c.l.bf16 %v1713_v18 }
 0x189   : > { %v3439_v31 = vunpack.c.h.bf16 %v1713_v18  ;;  %v1534_v32 = vadd.f32 %v1486_v11, %v1410_v24  ;;  %v1535_v33 = vadd.f32 %v1488_v63, %v1411_v25  ;;  %v1635_v42 = vrot.slane %v1580_v26, 2  ;;  %v1123_v63 = vld [vmem:[#allocation2 + $0x70] sm:$0x1] }
 0x18a   : > { %v1989_v49 = vunpack.c.l.bf16 %v1981_v22  ;;  %v1634_v39 = vsel %vm1187_vm11, %v1632_v28, %v1633_v1  ;;  %v1749_v40 = vsel %vm901_vm9, %v1747_v21, %v3435_v29  ;;  %v3445_v43 = vunpack.c.l.bf16 %v3435_v29 }
 0x18b   : > { %v1880_v44 = vmul.f32 %v3234_v4, %v3437_v30  ;;  %v1636_v2 = vsel %vm1187_vm11, %v1633_v1, %v1635_v42  ;;  %v1690_v48 = vadd.f32 %v1632_v28, %v1534_v32  ;;  %v1691_v51 = vadd.f32 %v1634_v39, %v1535_v33 }
 0x18c   : > { %v1787_v52 = vunpack.c.l.bf16 %v1749_v40  ;;  %v1692_v5 = vadd.f32 %v1636_v2, %v1536_v54  ;;  %v1788_v53 = vunpack.c.h.bf16 %v1749_v40  ;;  %v1817_v55 = vmul.f32 %v3215_v41, %v3445_v43 }
 0x18d   : > { %v1881_v56 = vmul.f32 %v3234_v4, %v3439_v31  ;;  %v1915_v59 = vrot.slane %v1880_v44, 1  ;;  %v2007_v60 = vmul.f32 %v3237_v8, %v3437_v30  ;;  %v2008_v61 = vmul.f32 %v3237_v8, %v3439_v31 }
 0x18e   : > { %v1815_v58 = vmul.f32 %v3215_v41, %v1787_v52  ;;  %v1816_v62 = vmul.f32 %v3215_v41, %v1788_v53  ;;  %v1841_v7 = vadd.f32 %v1817_v55, %v1692_v5  ;;  %v2009_v3 = vmul.f32 %v3237_v8, %v1989_v49  ;;  %v1285_v55 = vld [vmem:[#allocation2 + $0x78] sm:$0x80] }
 0x18f   : > { %v1916_v35 = vrot.slane %v1881_v56, 1  ;;  %v2061_v34 = vrot.slane %v2007_v60, 2  ;;  %v2062_v6 = vrot.slane %v2008_v61, 2  ;;  %v914_v9 = vrot.slane %v877_v57, 4 }
 0x190   : > { %v1839_v16 = vadd.f32 %v1815_v58, %v1690_v48  ;;  %v1840_v12 = vadd.f32 %v1816_v62, %v1691_v51  ;;  %v2064_v14 = vrot.slane %v2009_v3, 2  ;;  %v984_v18 = vmul.f32 %v3371_v23, %v3160_v45 }
 0x191   : > { %v1917_v11 = vsel %vm1046_vm10, %v1915_v59, %v1916_v35  ;;  %v1965_v13 = vadd.f32 %v1916_v35, %v1841_v7  ;;  %v2063_v15 = vsel %vm1187_vm11, %v2061_v34, %v2062_v6  ;;  %v916_v38 = vsel %vm901_vm9, %v914_v9, %v3365_v10 }
 0x192   : > { %v1963_v36 = vadd.f32 %v1915_v59, %v1839_v16  ;;  %v1964_v54 = vadd.f32 %v1917_v11, %v1840_v12  ;;  %v2065_v20 = vsel %vm1187_vm11, %v2062_v6, %v2064_v14  ;;  %v954_v21 = vunpack.c.l.bf16 %v916_v38  ;;  %v1553_v12 = vld [vmem:[#allocation2 + $0x88] sm:$0x1] }
 0x193   : > { %v955_v22 = vunpack.c.h.bf16 %v916_v38  ;;  %v2121_v25 = vadd.f32 %v2065_v20, %v1965_v13  ;;  %v1022_v26 = vmul.f32 %v3375_v27, %v3163_v46  ;;  %v1023_v28 = vmul.f32 %v3377_v0, %v3163_v46 }
 0x194   : > { %v2119_v24 = vadd.f32 %v2061_v34, %v1963_v36  ;;  %v2120_v1 = vadd.f32 %v2063_v15, %v1964_v54  ;;  %v982_v10 = vmul.f32 %v3160_v45, %v954_v21  ;;  %v1131_v23 = vunpack.c.l.bf16 %v1123_v63 }
 0x195   : > { %v983_v32 = vmul.f32 %v3160_v45, %v955_v22  ;;  %v2152_v42 = vadd.f32 %v3260_v37, %v2121_v25  ;;  %v1059_v49 = vrot.slane %v1022_v26, 1  ;;  %v1060_v39 = vrot.slane %v1023_v28, 1  ;;  %v1715_v25 = vld [vmem:[#allocation2 + $0x98] sm:$0xff] }
 0x196   : > { %v2150_v33 = vadd.f32 %v3260_v37, %v2119_v24  ;;  %v2151_v40 = vadd.f32 %v3260_v37, %v2120_v1  ;;  %v1151_v44 = vmul.f32 %v3375_v27, %v3166_v47  ;;  %v1152_v2 = vmul.f32 %v3377_v0, %v3166_v47  ;;  %v1714_v24 = vld [vmem:[#allocation2 + $0x90] sm:$0x80] }
 0x197   : > { %v1153_v48 = vmul.f32 %v3166_v47, %v1131_v23  ;;  %v2176_v52 = vmax.f32 %v2152_v42, 0.0  ;;  %v1061_v5 = vsel %vm1046_vm10, %v1059_v49, %v1060_v39  ;;  %v1107_v53 = vadd.f32 %v1059_v49, %v982_v10 }
 0x198   : > { %v2174_v51 = vmax.f32 %v2150_v33, 0.0  ;;  %v2175_v56 = vmax.f32 %v2151_v40, 0.0  ;;  %v1108_v57 = vadd.f32 %v1061_v5, %v983_v32  ;;  %v1109_v58 = vadd.f32 %v1060_v39, %v984_v18 }
 0x199   : > { %v1208_v59 = vrot.slane %v1151_v44, 2  ;;  %v2200_v61 = vmin.f32 %v2176_v52, 6.0  ;;  %v1209_v62 = vrot.slane %v1152_v2, 2  ;;  %v1211_v7 = vrot.slane %v1153_v48, 2 }
 0x19a   : > { %v2198_v60 = vmin.f32 %v2174_v51, 6.0  ;;  %v2199_v27 = vmin.f32 %v2175_v56, 6.0  ;;  %v1321_v3 = vrot.slane %v1285_v55, 4  ;;  %v1391_v0 = vmul.f32 %v3445_v43, %v3172_v50 }
 0x19b   : > { %v1264_v35 = vadd.f32 %v1208_v59, %v1107_v53  ;;  %v2256_v34 = vrot.slane %v2200_v61, 7  ;;  %v1210_v6 = vsel %vm1187_vm11, %v1208_v59, %v1209_v62  ;;  %v1212_v9 = vsel %vm1187_vm11, %v1209_v62, %v1211_v7  ;;  %v1982_v61 = vld [vmem:[#allocation2 + $0xa0] sm:$0x1] }
 0x19c   : > { %v2253_v16 = vrot.slane %v2198_v60, 7  ;;  %v2254_v11 = vrot.slane %v2199_v27, 7  ;;  %v1265_v13 = vadd.f32 %v1210_v6, %v1108_v57  ;;  %v1266_v14 = vadd.f32 %v1212_v9, %v1109_v58 }
 0x19d   : > { %v1323_v36 = vsel %vm901_vm9, %v1321_v3, %v3435_v29  ;;  %v1453_v18 = vmul.f32 %v3437_v30, %v3195_v17  ;;  %v1454_v63 = vmul.f32 %v3439_v31, %v3195_v17  ;;  %v1561_v22 = vunpack.c.l.bf16 %v1553_v12  ;;  %v879_v3 = vld [vmem:[#allocation2 + $0x78] sm:$0x80] }
 0x19e   : > { %v1361_v15 = vunpack.c.l.bf16 %v1323_v36  ;;  %v1362_v38 = vunpack.c.h.bf16 %v1323_v36  ;;  %v2255_v54 = vsel %vm2237_vm12, %v2253_v16, %v2254_v11  ;;  %v2257_v20 = vsel %vm2237_vm12, %v2254_v11, %v2256_v34 }
 0x19f   : > { %v1415_v21 = vadd.f32 %v1391_v0, %v1266_v14  ;;  %v2297_v26 = vpack.c.bf16 %v2257_v20, %v2255_v54  ;;  %v1489_v10 = vrot.slane %v1453_v18, 1  ;;  %v1490_v32 = vrot.slane %v1454_v63, 1 }
 0x1a0   : > { %v1389_v28 = vmul.f32 %v3172_v50, %v1361_v15  ;;  %v1390_v1 = vmul.f32 %v3172_v50, %v1362_v38  ;;  %v1581_v23 = vmul.f32 %v3437_v30, %v3198_v19  ;;  %v1582_v33 = vmul.f32 %v3439_v31, %v3198_v19 }
 0x1a1   : > { %v1583_v42 = vmul.f32 %v3198_v19, %v1561_v22  ;;  %2817 = vmatmul.mubr.msk.bf16.gmra.mrb[4].mxu1 %vm778_vm8, %v2297_v26  ;;  %v1750_v40 = vrot.slane %v1714_v24, 4  ;;  %v3503_v44 = vrot.slane %v1715_v25, 4  ;;  %v1491_v2 = vsel %vm1046_vm10, %v1489_v10, %v1490_v32 }
 0x1a2   : > { %v1413_v49 = vadd.f32 %v1389_v28, %v1264_v35  ;;  %v1414_v39 = vadd.f32 %v1390_v1, %v1265_v13  ;;  %v1539_v48 = vadd.f32 %v1490_v32, %v1415_v21  ;;  %v1637_v51 = vrot.slane %v1581_v23, 2 }
 0x1a3   : > { %v1638_v52 = vrot.slane %v1582_v33, 2  ;;  %v1640_v55 = vrot.slane %v1583_v42, 2  ;;  %v1752_v56 = vsel %vm901_vm9, %v1750_v40, %v3503_v44  ;;  %v3510_v60 = vunpack.c.l.bf16 %v3503_v44 }
 0x1a4   : > { %v1537_v5 = vadd.f32 %v1489_v10, %v1413_v49  ;;  %v1538_v53 = vadd.f32 %v1491_v2, %v1414_v39  ;;  %v1790_v58 = vunpack.c.l.bf16 %v1752_v56  ;;  %v1791_v59 = vunpack.c.h.bf16 %v1752_v56  ;;  %v1124_v49 = vld [vmem:[#allocation2 + $0x88] sm:$0x1] }
 0x1a5   : > { %v1639_v57 = vsel %vm1187_vm11, %v1637_v51, %v1638_v52  ;;  %v1641_v62 = vsel %vm1187_vm11, %v1638_v52, %v1640_v55  ;;  %v3513_v35 = vunpack.c.l.bf16 %v1715_v25  ;;  %v1820_v6 = vmul.f32 %v3215_v41, %v3510_v60 }
 0x1a6   : > { %v1693_v7 = vadd.f32 %v1637_v51, %v1537_v5  ;;  %v1694_v27 = vadd.f32 %v1639_v57, %v1538_v53  ;;  %v1695_v0 = vadd.f32 %v1641_v62, %v1539_v48  ;;  %v1818_v16 = vmul.f32 %v3215_v41, %v1790_v58  ;;  %v1287_v62 = vld [vmem:[#allocation2 + $0x90] sm:$0x80] }
 0x1a7   : > { %v1819_v34 = vmul.f32 %v3215_v41, %v1791_v59  ;;  %v3519_v9 = vunpack.c.h.bf16 %v1715_v25  ;;  %v1882_v12 = vmul.f32 %v3234_v4, %v3513_v35  ;;  %v1990_v11 = vunpack.c.l.bf16 %v1982_v61 }
 0x1a8   : > { %v2010_v13 = vmul.f32 %v3237_v8, %v3513_v35  ;;  %v1842_v14 = vadd.f32 %v1818_v16, %v1693_v7  ;;  %v1844_v15 = vadd.f32 %v1820_v6, %v1695_v0  ;;  %v917_v38 = vrot.slane %v879_v3, 4 }
 0x1a9   : > { %v1843_v36 = vadd.f32 %v1819_v34, %v1694_v27  ;;  %v1883_v18 = vmul.f32 %v3234_v4, %v3519_v9  ;;  %v1918_v63 = vrot.slane %v1882_v12, 1  ;;  %v2011_v54 = vmul.f32 %v3237_v8, %v3519_v9 }
 0x1aa   : > { %v2012_v20 = vmul.f32 %v3237_v8, %v1990_v11  ;;  %v2066_v21 = vrot.slane %v2010_v13, 2  ;;  %v919_v22 = vsel %vm901_vm9, %v917_v38, %v3435_v29  ;;  %v987_v24 = vmul.f32 %v3445_v43, %v3160_v45 }
 0x1ab   : > { %v1024_v25 = vmul.f32 %v3437_v30, %v3163_v46  ;;  %v1919_v26 = vrot.slane %v1883_v18, 1  ;;  %v1966_v28 = vadd.f32 %v1918_v63, %v1842_v14  ;;  %v2067_v1 = vrot.slane %v2011_v54, 2 }
 0x1ac   : > { %v2069_v10 = vrot.slane %v2012_v20, 2  ;;  %v957_v32 = vunpack.c.l.bf16 %v919_v22  ;;  %v958_v23 = vunpack.c.h.bf16 %v919_v22  ;;  %v1025_v33 = vmul.f32 %v3439_v31, %v3163_v46  ;;  %v1554_v20 = vld [vmem:[#allocation2 + $0xa0] sm:$0x1] }
 0x1ad   : > { %v1062_v42 = vrot.slane %v1024_v25, 1  ;;  %v1920_v39 = vsel %vm1046_vm10, %v1918_v63, %v1919_v26  ;;  %v1968_v29 = vadd.f32 %v1919_v26, %v1844_v15  ;;  %v2068_v40 = vsel %vm1187_vm11, %v2066_v21, %v2067_v1 }
 0x1ae   : > { %v2070_v43 = vsel %vm1187_vm11, %v2067_v1, %v2069_v10  ;;  %v1967_v2 = vadd.f32 %v1920_v39, %v1843_v36  ;;  %v2122_v48 = vadd.f32 %v2066_v21, %v1966_v28  ;;  %v985_v51 = vmul.f32 %v3160_v45, %v957_v32 }
 0x1af   : > { %v986_v52 = vmul.f32 %v3160_v45, %v958_v23  ;;  %v2124_v5 = vadd.f32 %v2070_v43, %v1968_v29  ;;  %v1063_v53 = vrot.slane %v1025_v33, 1  ;;  %v1132_v55 = vunpack.c.l.bf16 %v1124_v49 }
 0x1b0   : > { %v1154_v56 = vmul.f32 %v3437_v30, %v3166_v47  ;;  %v2123_v57 = vadd.f32 %v2068_v40, %v1967_v2  ;;  %v2153_v58 = vadd.f32 %v3260_v37, %v2122_v48  ;;  %v1110_v59 = vadd.f32 %v1062_v42, %v985_v51 }
 0x1b1   : > { %v1155_v61 = vmul.f32 %v3439_v31, %v3166_v47  ;;  %v2155_v7 = vadd.f32 %v3260_v37, %v2124_v5  ;;  %v1064_v27 = vsel %vm1046_vm10, %v1062_v42, %v1063_v53  ;;  %v1112_v3 = vadd.f32 %v1063_v53, %v987_v24 }
 0x1b2   : > { %v1156_v0 = vmul.f32 %v3166_v47, %v1132_v55  ;;  %v2154_v16 = vadd.f32 %v3260_v37, %v2123_v57  ;;  %v2177_v34 = vmax.f32 %v2153_v58, 0.0  ;;  %v1111_v6 = vadd.f32 %v1064_v27, %v986_v52  ;;  %v1716_v52 = vld [vmem:[#allocation2 + $0xa8] sm:$0x80]  ;;  %v1717_v57 = vld [vmem:[#allocation2 + $0xb0] sm:$0xff] }
 0x1b3   : > { %v1213_v30 = vrot.slane %v1154_v56, 2  ;;  %v2179_v12 = vmax.f32 %v2155_v7, 0.0  ;;  %v1214_v11 = vrot.slane %v1155_v61, 2  ;;  %v1324_v14 = vrot.slane %v1287_v62, 4  ;;  %v1983_v7 = vld [vmem:[#allocation2 + $0xb8] sm:$0x1] }
 0x1b4   : > { %v1216_v13 = vrot.slane %v1156_v0, 2  ;;  %v2178_v36 = vmax.f32 %v2154_v16, 0.0  ;;  %v2201_v15 = vmin.f32 %v2177_v34, 6.0  ;;  %v1394_v38 = vmul.f32 %v3510_v60, %v3172_v50 }
 0x1b5   : > { %v1267_v31 = vadd.f32 %v1213_v30, %v1110_v59  ;;  %v2203_v18 = vmin.f32 %v2179_v12, 6.0  ;;  %v1215_v63 = vsel %vm1187_vm11, %v1213_v30, %v1214_v11  ;;  %v1326_v37 = vsel %vm901_vm9, %v1324_v14, %v3503_v44 }
 0x1b6   : > { %v1217_v54 = vsel %vm1187_vm11, %v1214_v11, %v1216_v13  ;;  %v2202_v21 = vmin.f32 %v2178_v36, 6.0  ;;  %v2258_v22 = vrot.slane %v2201_v15, 7  ;;  %v1268_v24 = vadd.f32 %v1215_v63, %v1111_v6 }
 0x1b7   : > { %v1269_v25 = vadd.f32 %v1217_v54, %v1112_v3  ;;  %v2261_v26 = vrot.slane %v2203_v18, 7  ;;  %v1364_v28 = vunpack.c.l.bf16 %v1326_v37  ;;  %v1365_v1 = vunpack.c.h.bf16 %v1326_v37 }
 0x1b8   : > { %v1455_v10 = vmul.f32 %v3513_v35, %v3195_v17  ;;  %v2259_v32 = vrot.slane %v2202_v21, 7  ;;  %v1456_v33 = vmul.f32 %v3519_v9, %v3195_v17  ;;  %v1562_v42 = vunpack.c.l.bf16 %v1554_v20  ;;  %v881_v21 = vld [vmem:[#allocation2 + $0x90] sm:$0x80] }
 0x1b9   : > { %v1418_v23 = vadd.f32 %v1394_v38, %v1269_v25  ;;  %v1392_v49 = vmul.f32 %v3172_v50, %v1364_v28  ;;  %v1393_v39 = vmul.f32 %v3172_v50, %v1365_v1  ;;  %v1584_v40 = vmul.f32 %v3513_v35, %v3198_v19 }
 0x1ba   : > { %v1492_v29 = vrot.slane %v1455_v10, 1  ;;  %v2260_v43 = vsel %vm2237_vm12, %v2258_v22, %v2259_v32  ;;  %v2262_v2 = vsel %vm2237_vm12, %v2259_v32, %v2261_v26  ;;  %v1493_v48 = vrot.slane %v1456_v33, 1 }
 0x1bb   : > { %v1585_v51 = vmul.f32 %v3519_v9, %v3198_v19  ;;  %v2298_v5 = vpack.c.bf16 %v2262_v2, %v2260_v43  ;;  %v1416_v53 = vadd.f32 %v1392_v49, %v1267_v31  ;;  %v1417_v55 = vadd.f32 %v1393_v39, %v1268_v24  ;;  %v1125_v2 = vld [vmem:[#allocation2 + $0xa0] sm:$0x1] }
 0x1bc   : > { %v1586_v56 = vmul.f32 %v3198_v19, %v1562_v42  ;;  %v1494_v58 = vsel %vm1046_vm10, %v1492_v29, %v1493_v48  ;;  %v1542_v59 = vadd.f32 %v1493_v48, %v1418_v23  ;;  %v1642_v61 = vrot.slane %v1584_v40, 2 }
 0x1bd   : > { %v1643_v62 = vrot.slane %v1585_v51, 2  ;;  %2820 = vmatprep.mubr.msk.bf16.mxu1 %vm778_vm8, %v2298_v5  ;;  %v1540_v27 = vadd.f32 %v1492_v29, %v1416_v53  ;;  %v1541_v3 = vadd.f32 %v1494_v58, %v1417_v55  ;;  %v1753_v16 = vrot.slane %v1716_v52, 4 }
 0x1be   : > { %v1645_v0 = vrot.slane %v1586_v56, 2  ;;  %v3574_v6 = vrot.slane %v1717_v57, 4  ;;  %v3576_v30 = vunpack.c.l.bf16 %v1717_v57  ;;  %v3578_v12 = vunpack.c.h.bf16 %v1717_v57 }
 0x1bf   : > { %v1644_v34 = vsel %vm1187_vm11, %v1642_v61, %v1643_v62  ;;  %v1696_v13 = vadd.f32 %v1642_v61, %v1540_v27  ;;  %v1991_v36 = vunpack.c.l.bf16 %v1983_v7  ;;  %v920_v49 = vrot.slane %v881_v21, 4 }
 0x1c0   : > { %v1646_v11 = vsel %vm1187_vm11, %v1643_v62, %v1645_v0  ;;  %v1697_v14 = vadd.f32 %v1644_v34, %v1541_v3  ;;  %v1755_v31 = vsel %vm901_vm9, %v1753_v16, %v3574_v6  ;;  %v3584_v38 = vunpack.c.l.bf16 %v3574_v6 }
 0x1c1   : > { %v1698_v15 = vadd.f32 %v1646_v11, %v1542_v59  ;;  %v1884_v18 = vmul.f32 %v3234_v4, %v3576_v30  ;;  %v1793_v63 = vunpack.c.l.bf16 %v1755_v31  ;;  %v1794_v54 = vunpack.c.h.bf16 %v1755_v31  ;;  %v1289_v31 = vld [vmem:[#allocation2 + $0xa8] sm:$0x80] }
 0x1c2   : > { %v1885_v37 = vmul.f32 %v3234_v4, %v3578_v12  ;;  %v2013_v20 = vmul.f32 %v3237_v8, %v3576_v30  ;;  %v1823_v22 = vmul.f32 %v3215_v41, %v3584_v38  ;;  %v2014_v25 = vmul.f32 %v3237_v8, %v3578_v12 }
 0x1c3   : > { %v1921_v24 = vrot.slane %v1884_v18, 1  ;;  %v2015_v26 = vmul.f32 %v3237_v8, %v1991_v36  ;;  %v1821_v28 = vmul.f32 %v3215_v41, %v1793_v63  ;;  %v1822_v1 = vmul.f32 %v3215_v41, %v1794_v54 }
 0x1c4   : > { %v1922_v10 = vrot.slane %v1885_v37, 1  ;;  %v2071_v32 = vrot.slane %v2013_v20, 2  ;;  %v1847_v23 = vadd.f32 %v1823_v22, %v1698_v15  ;;  %v2072_v33 = vrot.slane %v2014_v25, 2 }
 0x1c5   : > { %v2074_v42 = vrot.slane %v2015_v26, 2  ;;  %v1845_v39 = vadd.f32 %v1821_v28, %v1696_v13  ;;  %v1846_v29 = vadd.f32 %v1822_v1, %v1697_v14  ;;  %v990_v43 = vmul.f32 %v3510_v60, %v3160_v45 }
 0x1c6   : > { %v1923_v40 = vsel %vm1046_vm10, %v1921_v24, %v1922_v10  ;;  %v1971_v48 = vadd.f32 %v1922_v10, %v1847_v23  ;;  %v2073_v51 = vsel %vm1187_vm11, %v2071_v32, %v2072_v33  ;;  %v922_v5 = vsel %vm901_vm9, %v920_v49, %v3503_v44  ;;  %v3615_v44 = vld [vmem:[%s3818_s6] ss:$0 sm:$0xff] }
 0x1c7   : > { %v2075_v52 = vsel %vm1187_vm11, %v2072_v33, %v2074_v42  ;;  %v1969_v53 = vadd.f32 %v1921_v24, %v1845_v39  ;;  %v1970_v55 = vadd.f32 %v1923_v40, %v1846_v29  ;;  %v960_v56 = vunpack.c.l.bf16 %v922_v5  ;;  %v1555_v39 = vld [vmem:[#allocation2 + $0xb8] sm:$0x1] }
 0x1c8   : > { %v961_v57 = vunpack.c.h.bf16 %v922_v5  ;;  %v2127_v58 = vadd.f32 %v2075_v52, %v1971_v48  ;;  %v1026_v59 = vmul.f32 %v3513_v35, %v3163_v46  ;;  %v1027_v60 = vmul.f32 %v3519_v9, %v3163_v46 }
 0x1c9   : > { %v1133_v61 = vunpack.c.l.bf16 %v1125_v2  ;;  %v2125_v62 = vadd.f32 %v2071_v32, %v1969_v53  ;;  %v2126_v7 = vadd.f32 %v2073_v51, %v1970_v55  ;;  %v988_v27 = vmul.f32 %v3160_v45, %v960_v56 }
 0x1ca   : > { %v989_v3 = vmul.f32 %v3160_v45, %v961_v57  ;;  %v2158_v0 = vadd.f32 %v3615_v44, %v2127_v58  ;;  %v1065_v16 = vrot.slane %v1026_v59, 1  ;;  %v1066_v34 = vrot.slane %v1027_v60, 1  ;;  %v1718_v58 = vld [vmem:[#allocation2 + $0xc0] sm:$0x80]  ;;  %v1719_v59 = vld [vmem:[#allocation2 + $0xc8] sm:$0xff] }
 0x1cb   : > { %v1157_v11 = vmul.f32 %v3513_v35, %v3166_v47  ;;  %v2156_v13 = vadd.f32 %v3615_v44, %v2125_v62  ;;  %v2157_v14 = vadd.f32 %v3615_v44, %v2126_v7  ;;  %v1158_v36 = vmul.f32 %v3519_v9, %v3166_v47 }
 0x1cc   : > { %v1159_v15 = vmul.f32 %v3166_v47, %v1133_v61  ;;  %v2182_v18 = vmax.f32 %v2158_v0, 0.0  ;;  %v1067_v63 = vsel %vm1046_vm10, %v1065_v16, %v1066_v34  ;;  %v1113_v54 = vadd.f32 %v1065_v16, %v988_v27 }
 0x1cd   : > { %v1115_v37 = vadd.f32 %v1066_v34, %v990_v43  ;;  %v2180_v20 = vmax.f32 %v2156_v13, 0.0  ;;  %v2181_v21 = vmax.f32 %v2157_v14, 0.0  ;;  %v1114_v22 = vadd.f32 %v1067_v63, %v989_v3 }
 0x1ce   : > { %v1218_v24 = vrot.slane %v1157_v11, 2  ;;  %v2206_v35 = vmin.f32 %v2182_v18, 6.0  ;;  %v1219_v25 = vrot.slane %v1158_v36, 2  ;;  %v1221_v26 = vrot.slane %v1159_v15, 2 }
 0x1cf   : > { %v1327_v28 = vrot.slane %v1289_v31, 4  ;;  %v2204_v1 = vmin.f32 %v2180_v20, 6.0  ;;  %v2205_v10 = vmin.f32 %v2181_v21, 6.0  ;;  %v1397_v9 = vmul.f32 %v3584_v38, %v3172_v50 }
 0x1d0   : > { %v1270_v32 = vadd.f32 %v1218_v24, %v1113_v54  ;;  %v2266_v23 = vrot.slane %v2206_v35, 7  ;;  %v1220_v33 = vsel %vm1187_vm11, %v1218_v24, %v1219_v25  ;;  %v1222_v42 = vsel %vm1187_vm11, %v1219_v25, %v1221_v26  ;;  %v1984_v25 = vld [vmem:[#allocation2 + $0xd0] sm:$0x1] }
 0x1d1   : > { %v1329_v49 = vsel %vm901_vm9, %v1327_v28, %v3574_v6  ;;  %v2263_v29 = vrot.slane %v2204_v1, 7  ;;  %v2264_v40 = vrot.slane %v2205_v10, 7  ;;  %v1271_v43 = vadd.f32 %v1220_v33, %v1114_v22 }
 0x1d2   : > { %v1272_v2 = vadd.f32 %v1222_v42, %v1115_v37  ;;  %v1367_v48 = vunpack.c.l.bf16 %v1329_v49  ;;  %v1368_v51 = vunpack.c.h.bf16 %v1329_v49  ;;  %v1457_v52 = vmul.f32 %v3576_v30, %v3195_v17 }
 0x1d3   : > { %v1458_v5 = vmul.f32 %v3578_v12, %v3195_v17  ;;  %v2265_v53 = vsel %vm2237_vm12, %v2263_v29, %v2264_v40  ;;  %v2267_v55 = vsel %vm2237_vm12, %v2264_v40, %v2266_v23  ;;  %v1563_v57 = vunpack.c.l.bf16 %v1555_v39 }
 0x1d4   : > { %v1421_v56 = vadd.f32 %v1397_v9, %v1272_v2  ;;  %v2299_v60 = vpack.c.bf16 %v2267_v55, %v2265_v53  ;;  %v1395_v61 = vmul.f32 %v3172_v50, %v1367_v48  ;;  %v1396_v62 = vmul.f32 %v3172_v50, %v1368_v51 }
 0x1d5   : > { %v1495_v7 = vrot.slane %v1457_v52, 1  ;;  %v1496_v27 = vrot.slane %v1458_v5, 1  ;;  %v1587_v3 = vmul.f32 %v3576_v30, %v3198_v19  ;;  %v1588_v0 = vmul.f32 %v3578_v12, %v3198_v19 }
 0x1d6   : > { %v1589_v16 = vmul.f32 %v3198_v19, %v1563_v57  ;;  %2821 = vmatmul.mubr.msk.bf16.gmra.mrb[8].mxu1 %vm778_vm8, %v2299_v60  ;;  %v1419_v34 = vadd.f32 %v1395_v61, %v1270_v32  ;;  %v1420_v11 = vadd.f32 %v1396_v62, %v1271_v43  ;;  %v1756_v13 = vrot.slane %v1718_v58, 4  ;;  %v883_v32 = vld [vmem:[#allocation2 + $0xa8] sm:$0x80] }
 0x1d7   : > { %v3646_v14 = vrot.slane %v1719_v59, 4  ;;  %v1497_v36 = vsel %vm1046_vm10, %v1495_v7, %v1496_v27  ;;  %v1545_v15 = vadd.f32 %v1496_v27, %v1421_v56  ;;  %v1647_v31 = vrot.slane %v1587_v3, 2 }
 0x1d8   : > { %v1648_v18 = vrot.slane %v1588_v0, 2  ;;  %v1543_v63 = vadd.f32 %v1495_v7, %v1419_v34  ;;  %v1544_v54 = vadd.f32 %v1497_v36, %v1420_v11  ;;  %v1650_v37 = vrot.slane %v1589_v16, 2  ;;  %v1126_v34 = vld [vmem:[#allocation2 + $0xb8] sm:$0x1] }
 0x1d9   : > { %v1758_v20 = vsel %vm901_vm9, %v1756_v13, %v3646_v14  ;;  %v1798_v35 = vunpack.c.l.bf16 %v3646_v14  ;;  %v3654_v10 = vunpack.c.l.bf16 %v1719_v59  ;;  %v3661_v49 = vunpack.c.h.bf16 %v1719_v59 }
 0x1da   : > { %v1649_v21 = vsel %vm1187_vm11, %v1647_v31, %v1648_v18  ;;  %v1796_v22 = vunpack.c.l.bf16 %v1758_v20  ;;  %v1797_v24 = vunpack.c.h.bf16 %v1758_v20  ;;  %v1651_v26 = vsel %vm1187_vm11, %v1648_v18, %v1650_v37 }
 0x1db   : > { %v1699_v28 = vadd.f32 %v1647_v31, %v1543_v63  ;;  %v1700_v1 = vadd.f32 %v1649_v21, %v1544_v54  ;;  %v1701_v9 = vadd.f32 %v1651_v26, %v1545_v15  ;;  %v1826_v42 = vmul.f32 %v3215_v41, %v1798_v35 }
 0x1dc   : > { %v1824_v23 = vmul.f32 %v3215_v41, %v1796_v22  ;;  %v1825_v33 = vmul.f32 %v3215_v41, %v1797_v24  ;;  %v1886_v39 = vmul.f32 %v3234_v4, %v3654_v10  ;;  %v1992_v29 = vunpack.c.l.bf16 %v1984_v25  ;;  %v1291_v25 = vld [vmem:[#allocation2 + $0xc0] sm:$0x80] }
 0x1dd   : > { %v2016_v40 = vmul.f32 %v3237_v8, %v3654_v10  ;;  %v1850_v48 = vadd.f32 %v1826_v42, %v1701_v9  ;;  %v923_v51 = vrot.slane %v883_v32, 4  ;;  %v1887_v52 = vmul.f32 %v3234_v4, %v3661_v49 }
 0x1de   : > { %v1848_v43 = vadd.f32 %v1824_v23, %v1699_v28  ;;  %v1849_v2 = vadd.f32 %v1825_v33, %v1700_v1  ;;  %v1924_v5 = vrot.slane %v1886_v39, 1  ;;  %v2017_v53 = vmul.f32 %v3237_v8, %v3661_v49 }
 0x1df   : > { %v2018_v55 = vmul.f32 %v3237_v8, %v1992_v29  ;;  %v2076_v56 = vrot.slane %v2016_v40, 2  ;;  %v925_v57 = vsel %vm901_vm9, %v923_v51, %v3574_v6  ;;  %v993_v58 = vmul.f32 %v3584_v38, %v3160_v45 }
 0x1e0   : > { %v1028_v59 = vmul.f32 %v3576_v30, %v3163_v46  ;;  %v1925_v60 = vrot.slane %v1887_v52, 1  ;;  %v1972_v61 = vadd.f32 %v1924_v5, %v1848_v43  ;;  %v2077_v62 = vrot.slane %v2017_v53, 2 }
 0x1e1   : > { %v2079_v7 = vrot.slane %v2018_v55, 2  ;;  %v963_v27 = vunpack.c.l.bf16 %v925_v57  ;;  %v964_v3 = vunpack.c.h.bf16 %v925_v57  ;;  %v1029_v0 = vmul.f32 %v3578_v12, %v3163_v46 }
 0x1e2   : > { %v1068_v16 = vrot.slane %v1028_v59, 1  ;;  %v1926_v11 = vsel %vm1046_vm10, %v1924_v5, %v1925_v60  ;;  %v1974_v6 = vadd.f32 %v1925_v60, %v1850_v48  ;;  %v2078_v13 = vsel %vm1187_vm11, %v2076_v56, %v2077_v62  ;;  %v1556_v5 = vld [vmem:[#allocation2 + $0xd0] sm:$0x1] }
 0x1e3   : > { %v2080_v38 = vsel %vm1187_vm11, %v2077_v62, %v2079_v7  ;;  %v1973_v36 = vadd.f32 %v1926_v11, %v1849_v2  ;;  %v2128_v15 = vadd.f32 %v2076_v56, %v1972_v61  ;;  %v991_v31 = vmul.f32 %v3160_v45, %v963_v27 }
 0x1e4   : > { %v992_v18 = vmul.f32 %v3160_v45, %v964_v3  ;;  %v2130_v63 = vadd.f32 %v2080_v38, %v1974_v6  ;;  %v1069_v54 = vrot.slane %v1029_v0, 1  ;;  %v1134_v37 = vunpack.c.l.bf16 %v1126_v34  ;;  %v1720_v38 = vld [vmem:[#allocation2 + $0xd8] sm:$0x80] }
 0x1e5   : > { %v1160_v46 = vmul.f32 %v3576_v30, %v3166_v47  ;;  %v2129_v20 = vadd.f32 %v2078_v13, %v1973_v36  ;;  %v2159_v21 = vadd.f32 %v3615_v44, %v2128_v15  ;;  %v1116_v22 = vadd.f32 %v1068_v16, %v991_v31 }
 0x1e6   : > { %v1161_v24 = vmul.f32 %v3578_v12, %v3166_v47  ;;  %v2161_v26 = vadd.f32 %v3615_v44, %v2130_v63  ;;  %v1070_v28 = vsel %vm1046_vm10, %v1068_v16, %v1069_v54  ;;  %v1118_v1 = vadd.f32 %v1069_v54, %v993_v58 }
 0x1e7   : > { %v1162_v45 = vmul.f32 %v3166_v47, %v1134_v37  ;;  %v2160_v32 = vadd.f32 %v3615_v44, %v2129_v20  ;;  %v2183_v9 = vmax.f32 %v2159_v21, 0.0  ;;  %v1117_v23 = vadd.f32 %v1070_v28, %v992_v18  ;;  %v1721_v18 = vld [vmem:[#allocation2 + $0xe0] sm:$0xff]  ;;  %v1985_v37 = vld [vmem:[#allocation2 + $0xe8] sm:$0x1] }
 0x1e8   : > { %v1223_v30 = vrot.slane %v1160_v46, 2  ;;  %v2185_v33 = vmax.f32 %v2161_v26, 0.0  ;;  %v1224_v42 = vrot.slane %v1161_v24, 2  ;;  %v1330_v29 = vrot.slane %v1291_v25, 4 }
 0x1e9   : > { %v1226_v39 = vrot.slane %v1162_v45, 2  ;;  %v2184_v40 = vmax.f32 %v2160_v32, 0.0  ;;  %v2207_v43 = vmin.f32 %v2183_v9, 6.0  ;;  %v1400_v2 = vmul.f32 %v1798_v35, %v3172_v50 }
 0x1ea   : > { %v1273_v12 = vadd.f32 %v1223_v30, %v1116_v22  ;;  %v2209_v48 = vmin.f32 %v2185_v33, 6.0  ;;  %v1225_v51 = vsel %vm1187_vm11, %v1223_v30, %v1224_v42  ;;  %v1332_v52 = vsel %vm901_vm9, %v1330_v29, %v3646_v14 }
 0x1eb   : > { %v1227_v47 = vsel %vm1187_vm11, %v1224_v42, %v1226_v39  ;;  %v2208_v53 = vmin.f32 %v2184_v40, 6.0  ;;  %v2268_v55 = vrot.slane %v2207_v43, 7  ;;  %v1274_v56 = vadd.f32 %v1225_v51, %v1117_v23 }
 0x1ec   : > { %v1275_v57 = vadd.f32 %v1227_v47, %v1118_v1  ;;  %v2271_v58 = vrot.slane %v2209_v48, 7  ;;  %v1370_v59 = vunpack.c.l.bf16 %v1332_v52  ;;  %v1371_v60 = vunpack.c.h.bf16 %v1332_v52 }
 0x1ed   : > { %v1459_v61 = vmul.f32 %v3654_v10, %v3195_v17  ;;  %v2269_v35 = vrot.slane %v2208_v53, 7  ;;  %v1460_v7 = vmul.f32 %v3661_v49, %v3195_v17  ;;  %v1564_v27 = vunpack.c.l.bf16 %v1556_v5 }
 0x1ee   : > { %v1424_v62 = vadd.f32 %v1400_v2, %v1275_v57  ;;  %v1398_v3 = vmul.f32 %v3172_v50, %v1370_v59  ;;  %v1399_v14 = vmul.f32 %v3172_v50, %v1371_v60  ;;  %v1590_v16 = vmul.f32 %v3654_v10, %v3198_v19 }
 0x1ef   : > { %v1498_v0 = vrot.slane %v1459_v61, 1  ;;  %v2270_v34 = vsel %vm2237_vm12, %v2268_v55, %v2269_v35  ;;  %v2272_v11 = vsel %vm2237_vm12, %v2269_v35, %v2271_v58  ;;  %v1499_v6 = vrot.slane %v1460_v7, 1 }
 0x1f0   : > { %v1591_v13 = vmul.f32 %v3661_v49, %v3198_v19  ;;  %v2300_v36 = vpack.c.bf16 %v2272_v11, %v2270_v34  ;;  %v1422_v17 = vadd.f32 %v1398_v3, %v1273_v12  ;;  %v1423_v15 = vadd.f32 %v1399_v14, %v1274_v56 }
 0x1f1   : > { %v1592_v31 = vmul.f32 %v3198_v19, %v1564_v27  ;;  %v1500_v50 = vsel %vm1046_vm10, %v1498_v0, %v1499_v6  ;;  %v1548_v63 = vadd.f32 %v1499_v6, %v1424_v62  ;;  %v1652_v54 = vrot.slane %v1590_v16, 2 }
 0x1f2   : > { %v1653_v10 = vrot.slane %v1591_v13, 2  ;;  %2824 = vmatprep.mubr.msk.bf16.mxu1 %vm778_vm8, %v2300_v36  ;;  %v1546_v46 = vadd.f32 %v1498_v0, %v1422_v17  ;;  %v1547_v20 = vadd.f32 %v1500_v50, %v1423_v15  ;;  %v1759_v22 = vrot.slane %v1720_v38, 4  ;;  %v2727_v50 = vld [vmem:[%s3016_s28] sm:$0xff]  }
 0x1f3   : > { %v1655_v21 = vrot.slane %v1592_v31, 2  ;;  %v1760_v24 = vrot.slane %v1721_v18, 4  ;;  %v1868_v25 = vunpack.c.l.bf16 %v1721_v18  ;;  %v1869_v26 = vunpack.c.h.bf16 %v1721_v18  ;;  %v2758_v18 = vld [vmem:[%s3016_s28 + $0x8] sm:$0xff]  }
 0x1f4   : > { %v1654_v49 = vsel %vm1187_vm11, %v1652_v54, %v1653_v10  ;;  %v1702_v28 = vadd.f32 %v1652_v54, %v1546_v46  ;;  %v1993_v45 = vunpack.c.l.bf16 %v1985_v37 }
 0x1f5   : > { %v1656_v19 = vsel %vm1187_vm11, %v1653_v10, %v1655_v21  ;;  %v1703_v1 = vadd.f32 %v1654_v49, %v1547_v20  ;;  %v1761_v9 = vsel %vm901_vm9, %v1759_v22, %v1760_v24  ;;  %v1801_v23 = vunpack.c.l.bf16 %v1760_v24 }
 0x1f6   : > { %v1704_v32 = vadd.f32 %v1656_v19, %v1548_v63  ;;  %v1888_v30 = vmul.f32 %v3234_v4, %v1868_v25  ;;  %v1799_v33 = vunpack.c.l.bf16 %v1761_v9  ;;  %v1800_v42 = vunpack.c.h.bf16 %v1761_v9  ;;  %v2759_v9 = vld [vmem:[%s3016_s28 + $0x10] sm:$0xff]  }
 0x1f7   : > { %v1889_v39 = vmul.f32 %v3234_v4, %v1869_v26  ;;  %v2019_v29 = vmul.f32 %v3237_v8, %v1868_v25  ;;  %v1829_v40 = vmul.f32 %v3215_v41, %v1801_v23  ;;  %v2020_v12 = vmul.f32 %v3237_v8, %v1869_v26 }
 0x1f8   : > { %v1927_v43 = vrot.slane %v1888_v30, 1  ;;  %v2021_v2 = vmul.f32 %v3237_v8, %v1993_v45  ;;  %v1827_v48 = vmul.f32 %v3215_v41, %v1799_v33  ;;  %v1828_v51 = vmul.f32 %v3215_v41, %v1800_v42 }
 0x1f9   : > { %v1928_v47 = vrot.slane %v1889_v39, 1  ;;  %v2081_v52 = vrot.slane %v2019_v29, 2  ;;  %v1853_v5 = vadd.f32 %v1829_v40, %v1704_v32  ;;  %v2082_v53 = vrot.slane %v2020_v12, 2  ;;  %v2760_v32 = vld [vmem:[%s3016_s28 + $0x18] sm:$0xff]  }
 0x1fa   : > { %v2084_v55 = vrot.slane %v2021_v2, 2  ;;  %v1851_v56 = vadd.f32 %v1827_v48, %v1702_v28  ;;  %v1852_v4 = vadd.f32 %v1828_v51, %v1703_v1  ;;  %v2732_v63 = vunpack.c.l.bf16 %v2758_v18 }
 0x1fb   : > { %v1929_v57 = vsel %vm1046_vm10, %v1927_v43, %v1928_v47  ;;  %v1977_v58 = vadd.f32 %v1928_v47, %v1853_v5  ;;  %v2083_v59 = vsel %vm1187_vm11, %v2081_v52, %v2082_v53  ;;  %v2728_v10 = vunpack.c.l.bf16 %v2727_v50 }
 0x1fc   : > { %v2085_v60 = vsel %vm1187_vm11, %v2082_v53, %v2084_v55  ;;  %v1975_v61 = vadd.f32 %v1927_v43, %v1851_v56  ;;  %v1976_v8 = vadd.f32 %v1929_v57, %v1852_v4  ;;  %v2733_v20 = vunpack.c.h.bf16 %v2758_v18  ;;  %v2762_v55 = vld [vmem:[%s3016_s28 + $0x28] sm:$0xff]   ;;  %v2761_v56 = vld [vmem:[%s3016_s28 + $0x20] sm:$0xff]  }
 0x1fd   : > { %v2133_v35 = vadd.f32 %v2085_v60, %v1977_v58  ;;  %v2729_v49 = vunpack.c.h.bf16 %v2727_v50  ;;  %v2740_v23 = vunpack.c.l.bf16 %v2760_v32  ;;  %v2736_v33 = vunpack.c.l.bf16 %v2759_v9 }
 0x1fe   : > { %v2131_v62 = vadd.f32 %v2081_v52, %v1975_v61  ;;  %v2132_v7 = vadd.f32 %v2083_v59, %v1976_v8  ;;  %v2741_v29 = vunpack.c.h.bf16 %v2760_v32  ;;  %v2737_v12 = vunpack.c.h.bf16 %v2759_v9 }
 0x1ff   : > { %v2164_v41 = vadd.f32 %v3615_v44, %v2133_v35  ;;  %v2748_v4 = vunpack.c.l.bf16 %v2762_v55  ;;  %v2744_v58 = vunpack.c.l.bf16 %v2761_v56  ;;  %v2749_v61 = vunpack.c.h.bf16 %v2762_v55 }
 0x200   : > { %v2162_v27 = vadd.f32 %v3615_v44, %v2131_v62  ;;  %v2163_v3 = vadd.f32 %v3615_v44, %v2132_v7  ;;  %v3741_v44 = vld [vmem:[%s3820_s8] ss:$0 sm:$0xff]  ;;  %v2745_v62 = vunpack.c.h.bf16 %v2761_v56 }
 0x201   : > { %v2188_v14 = vmax.f32 %v2164_v41, 0.0 }
 0x202   : > { %v2186_v0 = vmax.f32 %v2162_v27, 0.0  ;;  %v2187_v16 = vmax.f32 %v2163_v3, 0.0 }
 0x203   : > { %v2212_v34 = vmin.f32 %v2188_v14, 6.0 }
 0x204   : > { %v2210_v11 = vmin.f32 %v2186_v0, 6.0  ;;  %v2211_v6 = vmin.f32 %v2187_v16, 6.0 }
 0x205   : > { %v2276_v13 = vrot.slane %v2212_v34, 7  ;;  %v2764_v34 = vld [vmem:[%s3016_s28 + $0x38] sm:$0xff]  }
 0x206   : > { %v2273_v38 = vrot.slane %v2210_v11, 7  ;;  %v2274_v36 = vrot.slane %v2211_v6, 7  ;;  %v2763_v11 = vld [vmem:[%s3016_s28 + $0x30] sm:$0xff]   ;;  %v2756_v6 = vunpack.c.l.bf16 %v2764_v34 }
 0x207   : > { %v2753_v50 = vunpack.c.h.bf16 %v2763_v11 }
 0x208   : > { %v2275_v17 = vsel %vm2237_vm12, %v2273_v38, %v2274_v36  ;;  %v2277_v15 = vsel %vm2237_vm12, %v2274_v36, %v2276_v13  ;;  %v2752_v38 = vunpack.c.l.bf16 %v2763_v11 }
 0x209   : > { %v2301_v31 = vpack.c.bf16 %v2277_v15, %v2275_v17  ;;  %v2757_v15 = vunpack.c.h.bf16 %v2764_v34 }
 0x20b   : > { %2825 = vmatmul.mubr.msk.bf16.gmra.mrb[12].mxu1 %vm778_vm8, %v2301_v31 }
 0x23f   : > { %v2814_v54 = vpop.f32.mrb[0].mxu1 }
 0x240   : > { %v2392_v37 = vadd.f32 %v2814_v54, %v3741_v44  ;;  %v2383_v46 = vpop.f32.mrb[1].mxu1 }
 0x241   : > { %v2384_v21 = vadd.f32 %v3741_v44, %v2383_v46  ;;  %v2815_v22 = vpop.f32.mrb[2].mxu1 }
 0x242   : > { %v2480_v24 = vadd.f32 %v2732_v63, %v2392_v37  ;;  %v2395_v25 = vadd.f32 %v2815_v22, %v3741_v44  ;;  %v2386_v26 = vpop.f32.mrb[3].mxu1 }
 0x243   : > { %v2478_v19 = vadd.f32 %v2728_v10, %v2384_v21  ;;  %v2387_v28 = vadd.f32 %v3741_v44, %v2386_v26 }
 0x244   : > { %2496 = vst.msk [vmem:[%s3021_s18 + $0x10] sm:$0xff] %vm580_vm1, %v2480_v24  ;;  %v2481_v1 = vadd.f32 %v2733_v20, %v2395_v25 }
 0x245   : > { %2494 = vst.msk [vmem:[%s3021_s18] sm:$0xff] %vm580_vm1, %v2478_v19  ;;  %v2479_v45 = vadd.f32 %v2729_v49, %v2387_v28 }
 0x246   : > { %2497 = vst.msk [vmem:[%s3021_s18 + $0x18] sm:$0xff] %vm580_vm1, %v2481_v1 }
 0x247   : > { %2495 = vst.msk [vmem:[%s3021_s18 + $0x8] sm:$0xff] %vm580_vm1, %v2479_v45 }
 0x274   : > { %v2818_v30 = vpop.f32.mrb[4].mxu1 }
 0x275   : > { %v2408_v42 = vadd.f32 %v2818_v30, %v3741_v44  ;;  %v2399_v39 = vpop.f32.mrb[5].mxu1 }
 0x276   : > { %v2400_v40 = vadd.f32 %v3741_v44, %v2399_v39  ;;  %v2819_v43 = vpop.f32.mrb[6].mxu1 }
 0x277   : > { %v2484_v2 = vadd.f32 %v2740_v23, %v2408_v42  ;;  %v2411_v48 = vadd.f32 %v2819_v43, %v3741_v44  ;;  %v2402_v51 = vpop.f32.mrb[7].mxu1 }
 0x278   : > { %v2482_v47 = vadd.f32 %v2736_v33, %v2400_v40  ;;  %v2403_v52 = vadd.f32 %v3741_v44, %v2402_v51 }
 0x279   : > { %2500 = vst.msk [vmem:[%s3021_s18 + $0x30] sm:$0xff] %vm580_vm1, %v2484_v2  ;;  %v2485_v5 = vadd.f32 %v2741_v29, %v2411_v48 }
 0x27a   : > { %2498 = vst.msk [vmem:[%s3021_s18 + $0x20] sm:$0xff] %vm580_vm1, %v2482_v47  ;;  %v2483_v53 = vadd.f32 %v2737_v12, %v2403_v52 }
 0x27b   : > { %2501 = vst.msk [vmem:[%s3021_s18 + $0x38] sm:$0xff] %vm580_vm1, %v2485_v5 }
 0x27c   : > { %2499 = vst.msk [vmem:[%s3021_s18 + $0x28] sm:$0xff] %vm580_vm1, %v2483_v53 }
 0x2a9   : > { %v2822_v57 = vpop.f32.mrb[8].mxu1 }
 0x2aa   : > { %v2424_v59 = vadd.f32 %v2822_v57, %v3741_v44  ;;  %v2415_v60 = vpop.f32.mrb[9].mxu1 }
 0x2ab   : > { %v2416_v8 = vadd.f32 %v3741_v44, %v2415_v60  ;;  %v2823_v35 = vpop.f32.mrb[10].mxu1 }
 0x2ac   : > { %v2488_v7 = vadd.f32 %v2748_v4, %v2424_v59  ;;  %v2427_v41 = vadd.f32 %v2823_v35, %v3741_v44  ;;  %v2418_v27 = vpop.f32.mrb[11].mxu1 }
 0x2ad   : > { %v2486_v3 = vadd.f32 %v2744_v58, %v2416_v8  ;;  %v2419_v14 = vadd.f32 %v3741_v44, %v2418_v27 }
 0x2ae   : > { %2504 = vst.msk [vmem:[%s3021_s18 + $0x50] sm:$0xff] %vm580_vm1, %v2488_v7  ;;  %v2489_v0 = vadd.f32 %v2749_v61, %v2427_v41 }
 0x2af   : > { %2502 = vst.msk [vmem:[%s3021_s18 + $0x40] sm:$0xff] %vm580_vm1, %v2486_v3  ;;  %v2487_v16 = vadd.f32 %v2745_v62, %v2419_v14 }
 0x2b0   : > { %2505 = vst.msk [vmem:[%s3021_s18 + $0x58] sm:$0xff] %vm580_vm1, %v2489_v0 }
 0x2b1   : > { %2503 = vst.msk [vmem:[%s3021_s18 + $0x48] sm:$0xff] %vm580_vm1, %v2487_v16 }
 0x2de   : > { %v2826_v13 = vpop.f32.mrb[12].mxu1 }
 0x2df   : > { %v2440_v36 = vadd.f32 %v2826_v13, %v3741_v44  ;;  %v2431_v17 = vpop.f32.mrb[13].mxu1 }
 0x2e0   : > { %v2432_v31 = vadd.f32 %v3741_v44, %v2431_v17  ;;  %v2827_v18 = vpop.f32.mrb[14].mxu1 }
 0x2e1   : > { %v2492_v63 = vadd.f32 %v2756_v6, %v2440_v36  ;;  %v2443_v54 = vadd.f32 %v2827_v18, %v3741_v44  ;;  %v2434_v10 = vpop.f32.mrb[15].mxu1 }
 0x2e2   : > { %v2490_v37 = vadd.f32 %v2752_v38, %v2432_v31  ;;  %v2435_v46 = vadd.f32 %v3741_v44, %v2434_v10 }
 0x2e3   : > { %2508 = vst.msk [vmem:[%s3021_s18 + $0x70] sm:$0xff] %vm580_vm1, %v2492_v63  ;;  %v2493_v20 = vadd.f32 %v2757_v15, %v2443_v54 }
 0x2e4   : > { %2506 = vst.msk [vmem:[%s3021_s18 + $0x60] sm:$0xff] %vm580_vm1, %v2490_v37  ;;  %v2491_v21 = vadd.f32 %v2753_v50, %v2435_v46 }
 0x2e5   : > { %2509 = vst.msk [vmem:[%s3021_s18 + $0x78] sm:$0xff] %vm580_vm1, %v2493_v20 }
 0x2e6   : > { %2507 = vst.msk [vmem:[%s3021_s18 + $0x68] sm:$0xff] %vm580_vm1, %v2491_v21 }
 0x2e7 PF: > { %s19_s13 = sadd.s32 1, %s2923_s13   ;;  %s3828_s30 = smov %s2915_s11 }
 0x2e8   : > { %p16_p12 = scmp.ge.s32.totalorder %s19_s13, 6   ;;  %s3829_s10 = smov %s2919_s12 }
 0x2e9   : > { %s3830_s11 = smov %s3833_s14  ;;  %s3831_s12 = smov %s3837_s15 }
 0x2ea   :  { %18 = sbr.rel (!%p16_p12) target bundleno = 3 (0x3), region = 103 }

</bundles_post_ra>
